<compile_context>
chip_gen: v7x
topology: tpu7x:2x2x1
jax: 0.10.0
libtpu: 0.0.40
codegen_flags: <defaults>
</compile_context>

<pallas_src>
import functools
import math

import jax
import jax.numpy as jnp
from jax.experimental import pallas as pl
from jax.experimental.pallas import tpu as pltpu

LANE = 128


# ------------------------------ kernel ------------------------------------- #
def _mha_kernel(q_ref, k_ref, v_ref, wq_ref, wk_ref, wv_ref, wo_ref, bo_ref,
                o_ref, *, heads):
    """Single-invocation MHA: whole batch, all heads.

    Ref shapes:
      q_ref, k_ref, v_ref : (B, L, E)
      wq/wk/wv            : (E, E)      block-diag kron(I_H, W.T); scale in wq
      wo                  : (H, D, Ep)  fc_out weight, pre-transposed per head,
                                        lane-padded output dim
      bo                  : (1, Ep)     fc_out bias, lane-padded
      o_ref               : (B, L, Ep)  lane-dense output
    """
    B, L, E = q_ref.shape
    H = heads
    D = E // H
    N = H * B                      # fused (head, batch) attention-batch axis
    Ep = o_ref.shape[-1]

    # ---- projections: one fat MXU matmul each, all batches & heads at once ----
    q2 = q_ref[...].reshape(B * L, E)
    k2 = k_ref[...].reshape(B * L, E)
    v2 = v_ref[...].reshape(B * L, E)

    qp = jnp.dot(q2, wq_ref[...], preferred_element_type=jnp.float32)   # (B*L, E)
    kp = jnp.dot(k2, wk_ref[...], preferred_element_type=jnp.float32)
    vp = jnp.dot(v2, wv_ref[...], preferred_element_type=jnp.float32)

    # ---- head-major leading-batch views (the only layout shuffles): n = h*B+b --
    q3 = pltpu.einshape("mhd->hmd", qp.reshape(B * L, H, D)).reshape(N, L, D)
    k3 = pltpu.einshape("mhd->hmd", kp.reshape(B * L, H, D)).reshape(N, L, D)
    v3 = pltpu.einshape("mhd->hmd", vp.reshape(B * L, H, D)).reshape(N, L, D)

    # ---- scores (scale already folded into wq) + softmax, exact divide --------
    s = jnp.einsum("nqd,nkd->nqk", q3, k3,
                   preferred_element_type=jnp.float32)                   # (N, L, L)
    s_max = jnp.max(s, axis=-1, keepdims=True)
    p = jnp.exp(s - s_max)
    p = p / jnp.sum(p, axis=-1, keepdims=True)

    # ---- attention * V ---------------------------------------------------------
    o3 = jnp.einsum("nqk,nkd->nqd", p, v3,
                    preferred_element_type=jnp.float32)                   # (N, L, D)

    # ---- fused head-merge + fc_out: H accumulating matmuls, no transpose -------
    # (N, L, D) -> (H, B*L, D) is a pure reshape (n = h*B + b, rows stay (b, l)).
    o4 = o3.reshape(H, B * L, D)
    wo3 = wo_ref[...]                                                     # (H, D, Ep)
    acc = jnp.zeros((B * L, Ep), jnp.float32)
    for h in range(H):                 # static unroll; partial products accumulate
        acc = acc + jnp.dot(o4[h], wo3[h], preferred_element_type=jnp.float32)

    out = acc + bo_ref[...]                                               # (B*L, Ep)
    o_ref[...] = out.reshape(B, L, Ep).astype(o_ref.dtype)


# ------------------------------ wrapper ------------------------------------ #
def _prep_params(params):
    """Build kernel-friendly params once outside the kernel."""
    wq, wk, wv = params["wq"], params["wk"], params["wv"]    # (D, D)
    wo, bo = params["wo"], params["bo"]                      # (E, E), (1, E)
    D = wq.shape[0]
    E = wo.shape[0]
    H = E // D
    eye = jnp.eye(H, dtype=wq.dtype)
    scale = 1.0 / math.sqrt(D)

    # Block-diagonal, pre-transposed projection weights; score scale folded into wq.
    wq_bd = jnp.kron(eye, wq.T) * scale                      # (E, E)
    wk_bd = jnp.kron(eye, wk.T)
    wv_bd = jnp.kron(eye, wv.T)

    # fc_out: pre-transpose, pad output lanes to a multiple of 128, split per head.
    e_pad = ((E + LANE - 1) // LANE) * LANE
    wo_hd = (jnp.zeros((E, e_pad), wo.dtype).at[:, :E].set(wo.T)
             .reshape(H, D, e_pad))                          # (H, D, Ep)
    bo_p = jnp.zeros((1, e_pad), bo.dtype).at[:, :E].set(bo) # (1, Ep)
    return wq_bd, wk_bd, wv_bd, wo_hd, bo_p, H, e_pad


def multi_head_attention(key, query, value, params):
    """Pallas multi-head attention. key/query/value: (B, L, E) float32."""
    B, L, E = query.shape
    wq_bd, wk_bd, wv_bd, wo_hd, bo_p, H, e_pad = _prep_params(params)

    kernel = functools.partial(_mha_kernel, heads=H)
    vmem = pltpu.MemorySpace.VMEM

    # Single invocation: no grid, every operand is one whole-array VMEM block
    # (so the constant weights are not double-buffered either).
    out_pad = pl.pallas_call(
        kernel,
        out_shape=jax.ShapeDtypeStruct((B, L, e_pad), query.dtype),
        in_specs=[pl.BlockSpec(memory_space=vmem)] * 8,
        out_specs=pl.BlockSpec(memory_space=vmem),
    )(query, key, value, wq_bd, wk_bd, wv_bd, wo_hd, bo_p)

    # TODO(synk): at real sizes make E a multiple of 128 (or alias the padded
    # output) instead of slicing the lane padding off here.
    return out_pad[:, :, :E]


# ------------------------------ reference ---------------------------------- #
def _reference(key, query, value, params):
    """Pure-JAX reference mirroring the PyTorch forward exactly."""
    B, L, E = key.shape
    D = params["wq"].shape[0]
    H = E // D
    k = key.reshape(B, L, H, D) @ params["wk"].T
    q = query.reshape(B, L, H, D) @ params["wq"].T
    v = value.reshape(B, L, H, D) @ params["wv"].T
    prod = jnp.einsum("bqhd,bkhd->bhqk", q, k) / math.sqrt(D)
    scores = jax.nn.softmax(prod, axis=-1)
    out = jnp.einsum("nhql,nlhd->nqhd", scores, v).reshape(B, L, E)
    return out @ params["wo"].T + params["bo"][0]


# ------------------------------ main ---------------------------------------- #
if __name__ == "__main__":
    # Small shapes consistent with the module: embed_dim=32, heads=8 -> head=4.
    B, L, E, H = 2, 8, 32, 8
    D = E // H

    root = jax.random.PRNGKey(0)
    kx, kq, kv, k1, k2, k3, k4, k5 = jax.random.split(root, 8)

    key_in = jax.random.normal(kx, (B, L, E), dtype=jnp.float32)
    query_in = jax.random.normal(kq, (B, L, E), dtype=jnp.float32)
    value_in = jax.random.normal(kv, (B, L, E), dtype=jnp.float32)

    # Deterministic parameter init (nn.Linear-style scale 1/sqrt(fan_in)).
    params = {
        "wq": jax.random.uniform(k1, (D, D), jnp.float32, -1, 1) / math.sqrt(D),
        "wk": jax.random.uniform(k2, (D, D), jnp.float32, -1, 1) / math.sqrt(D),
        "wv": jax.random.uniform(k3, (D, D), jnp.float32, -1, 1) / math.sqrt(D),
        "wo": jax.random.uniform(k4, (E, E), jnp.float32, -1, 1) / math.sqrt(E),
        "bo": jax.random.uniform(k5, (1, E), jnp.float32, -1, 1) / math.sqrt(E),
    }

    out = multi_head_attention(key_in, query_in, value_in, params)
    out = jax.block_until_ready(out)

    ref = _reference(key_in, query_in, value_in, params)
    assert out.shape == (B, L, E), out.shape
    # Exact softmax divide restored (approx reciprocal removed); remaining
    # tolerance only covers MXU f32 multi-pass matmul rounding differences vs
    # the XLA reference path (values are O(1)).
    assert jnp.allclose(out, ref, atol=1e-3, rtol=1e-3), (
        float(jnp.max(jnp.abs(out - ref))))

    print("KERNEL_OK")
</pallas_src>

<mosaic_0001>
module attributes {stable_mosaic.version = 11 : i64} {
  func.func @_mha_kernel(%arg0: memref<2x8x32xf32, #tpu.memory_space<vmem>>, %arg1: memref<2x8x32xf32, #tpu.memory_space<vmem>>, %arg2: memref<2x8x32xf32, #tpu.memory_space<vmem>>, %arg3: memref<32x32xf32, #tpu.memory_space<vmem>>, %arg4: memref<32x32xf32, #tpu.memory_space<vmem>>, %arg5: memref<32x32xf32, #tpu.memory_space<vmem>>, %arg6: memref<8x4x128xf32, #tpu.memory_space<vmem>>, %arg7: memref<1x128xf32, #tpu.memory_space<vmem>>, %arg8: memref<2x8x128xf32, #tpu.memory_space<vmem>>) attributes {dimension_semantics = [], scalar_prefetch = 0 : i64, scratch_operands = 0 : i64, tpu.core_type = #tpu.core_type<tc>} {
    %c0 = arith.constant 0 : index
    %c0_0 = arith.constant 0 : index
    %c0_1 = arith.constant 0 : index
    %0 = vector.load %arg0[%c0, %c0_0, %c0_1] : memref<2x8x32xf32, #tpu.memory_space<vmem>>, vector<2x8x32xf32>
    %1 = vector.shape_cast %0 : vector<2x8x32xf32> to vector<16x32xf32>
    %c0_2 = arith.constant 0 : index
    %c0_3 = arith.constant 0 : index
    %c0_4 = arith.constant 0 : index
    %2 = vector.load %arg1[%c0_2, %c0_3, %c0_4] : memref<2x8x32xf32, #tpu.memory_space<vmem>>, vector<2x8x32xf32>
    %3 = vector.shape_cast %2 : vector<2x8x32xf32> to vector<16x32xf32>
    %c0_5 = arith.constant 0 : index
    %c0_6 = arith.constant 0 : index
    %c0_7 = arith.constant 0 : index
    %4 = vector.load %arg2[%c0_5, %c0_6, %c0_7] : memref<2x8x32xf32, #tpu.memory_space<vmem>>, vector<2x8x32xf32>
    %5 = vector.shape_cast %4 : vector<2x8x32xf32> to vector<16x32xf32>
    %c0_8 = arith.constant 0 : index
    %c0_9 = arith.constant 0 : index
    %6 = vector.load %arg3[%c0_8, %c0_9] : memref<32x32xf32, #tpu.memory_space<vmem>>, vector<32x32xf32>
    %cst = arith.constant dense<0.000000e+00> : vector<16x32xf32>
    %7 = tpu.matmul %1, %6, %cst {dimension_numbers = #tpu.dot_dimension_numbers<[1], [0], [0], [1], [0, 0, 1, 1], [], []>} : vector<16x32xf32>, vector<32x32xf32>, vector<16x32xf32> -> vector<16x32xf32>
    %c0_10 = arith.constant 0 : index
    %c0_11 = arith.constant 0 : index
    %8 = vector.load %arg4[%c0_10, %c0_11] : memref<32x32xf32, #tpu.memory_space<vmem>>, vector<32x32xf32>
    %cst_12 = arith.constant dense<0.000000e+00> : vector<16x32xf32>
    %9 = tpu.matmul %3, %8, %cst_12 {dimension_numbers = #tpu.dot_dimension_numbers<[1], [0], [0], [1], [0, 0, 1, 1], [], []>} : vector<16x32xf32>, vector<32x32xf32>, vector<16x32xf32> -> vector<16x32xf32>
    %c0_13 = arith.constant 0 : index
    %c0_14 = arith.constant 0 : index
    %10 = vector.load %arg5[%c0_13, %c0_14] : memref<32x32xf32, #tpu.memory_space<vmem>>, vector<32x32xf32>
    %cst_15 = arith.constant dense<0.000000e+00> : vector<16x32xf32>
    %11 = tpu.matmul %5, %10, %cst_15 {dimension_numbers = #tpu.dot_dimension_numbers<[1], [0], [0], [1], [0, 0, 1, 1], [], []>} : vector<16x32xf32>, vector<32x32xf32>, vector<16x32xf32> -> vector<16x32xf32>
    %12 = vector.shape_cast %7 : vector<16x32xf32> to vector<16x8x4xf32>
    %13 = tpu.transpose %12, [1, 0, 2] : vector<16x8x4xf32> -> vector<8x16x4xf32>
    %14 = vector.shape_cast %13 : vector<8x16x4xf32> to vector<16x8x4xf32>
    %15 = vector.shape_cast %9 : vector<16x32xf32> to vector<16x8x4xf32>
    %16 = tpu.transpose %15, [1, 0, 2] : vector<16x8x4xf32> -> vector<8x16x4xf32>
    %17 = vector.shape_cast %16 : vector<8x16x4xf32> to vector<16x8x4xf32>
    %18 = vector.shape_cast %11 : vector<16x32xf32> to vector<16x8x4xf32>
    %19 = tpu.transpose %18, [1, 0, 2] : vector<16x8x4xf32> -> vector<8x16x4xf32>
    %20 = vector.shape_cast %19 : vector<8x16x4xf32> to vector<16x8x4xf32>
    "tpu.trace_start"() <{level = 10 : i32, message = "nqd,nkd->nqk"}> : () -> ()
    %cst_16 = arith.constant dense<0.000000e+00> : vector<16x8x8xf32>
    %21 = tpu.matmul %14, %17, %cst_16 {dimension_numbers = #tpu.dot_dimension_numbers<[2], [2], [1], [1], [0, 0, 0, 1, 1, 1], [0], [0]>} : vector<16x8x4xf32>, vector<16x8x4xf32>, vector<16x8x8xf32> -> vector<16x8x8xf32>
    "tpu.trace_stop"() : () -> ()
    %cst_17 = arith.constant dense<0xFF800000> : vector<16x8xf32>
    %22 = vector.multi_reduction <maximumf>, %21, %cst_17 [2] : vector<16x8x8xf32> to vector<16x8xf32>
    %23 = vector.shape_cast %22 : vector<16x8xf32> to vector<16x8x1xf32>
    %24 = vector.broadcast %23 : vector<16x8x1xf32> to vector<16x8x8xf32>
    %25 = arith.subf %21, %24 : vector<16x8x8xf32>
    %26 = math.exp %25 : vector<16x8x8xf32>
    %cst_18 = arith.constant dense<0.000000e+00> : vector<16x8xf32>
    %27 = vector.multi_reduction <add>, %26, %cst_18 [2] : vector<16x8x8xf32> to vector<16x8xf32>
    %28 = vector.shape_cast %27 : vector<16x8xf32> to vector<16x8x1xf32>
    %29 = vector.broadcast %28 : vector<16x8x1xf32> to vector<16x8x8xf32>
    %30 = arith.divf %26, %29 : vector<16x8x8xf32>
    "tpu.trace_start"() <{level = 10 : i32, message = "nqk,nkd->nqd"}> : () -> ()
    %cst_19 = arith.constant dense<0.000000e+00> : vector<16x8x4xf32>
    %31 = tpu.matmul %30, %20, %cst_19 {dimension_numbers = #tpu.dot_dimension_numbers<[2], [1], [1], [2], [0, 0, 0, 1, 1, 2], [0], [0]>} : vector<16x8x8xf32>, vector<16x8x4xf32>, vector<16x8x4xf32> -> vector<16x8x4xf32>
    "tpu.trace_stop"() : () -> ()
    %32 = vector.shape_cast %31 : vector<16x8x4xf32> to vector<8x16x4xf32>
    %c0_20 = arith.constant 0 : index
    %c0_21 = arith.constant 0 : index
    %c0_22 = arith.constant 0 : index
    %33 = vector.load %arg6[%c0_20, %c0_21, %c0_22] : memref<8x4x128xf32, #tpu.memory_space<vmem>>, vector<8x4x128xf32>
    %cst_23 = arith.constant 0.000000e+00 : f32
    %34 = vector.broadcast %cst_23 : f32 to vector<16x128xf32>
    %35 = vector.extract_strided_slice %32 {offsets = [0, 0, 0], sizes = [1, 16, 4], strides = [1, 1, 1]} : vector<8x16x4xf32> to vector<1x16x4xf32>
    %36 = vector.shape_cast %35 : vector<1x16x4xf32> to vector<16x4xf32>
    %37 = vector.extract_strided_slice %33 {offsets = [0, 0, 0], sizes = [1, 4, 128], strides = [1, 1, 1]} : vector<8x4x128xf32> to vector<1x4x128xf32>
    %38 = vector.shape_cast %37 : vector<1x4x128xf32> to vector<4x128xf32>
    %cst_24 = arith.constant dense<0.000000e+00> : vector<16x128xf32>
    %39 = tpu.matmul %36, %38, %cst_24 {dimension_numbers = #tpu.dot_dimension_numbers<[1], [0], [0], [1], [0, 0, 1, 1], [], []>} : vector<16x4xf32>, vector<4x128xf32>, vector<16x128xf32> -> vector<16x128xf32>
    %40 = arith.addf %34, %39 : vector<16x128xf32>
    %41 = vector.extract_strided_slice %32 {offsets = [1, 0, 0], sizes = [1, 16, 4], strides = [1, 1, 1]} : vector<8x16x4xf32> to vector<1x16x4xf32>
    %42 = vector.shape_cast %41 : vector<1x16x4xf32> to vector<16x4xf32>
    %43 = vector.extract_strided_slice %33 {offsets = [1, 0, 0], sizes = [1, 4, 128], strides = [1, 1, 1]} : vector<8x4x128xf32> to vector<1x4x128xf32>
    %44 = vector.shape_cast %43 : vector<1x4x128xf32> to vector<4x128xf32>
    %cst_25 = arith.constant dense<0.000000e+00> : vector<16x128xf32>
    %45 = tpu.matmul %42, %44, %cst_25 {dimension_numbers = #tpu.dot_dimension_numbers<[1], [0], [0], [1], [0, 0, 1, 1], [], []>} : vector<16x4xf32>, vector<4x128xf32>, vector<16x128xf32> -> vector<16x128xf32>
    %46 = arith.addf %40, %45 : vector<16x128xf32>
    %47 = vector.extract_strided_slice %32 {offsets = [2, 0, 0], sizes = [1, 16, 4], strides = [1, 1, 1]} : vector<8x16x4xf32> to vector<1x16x4xf32>
    %48 = vector.shape_cast %47 : vector<1x16x4xf32> to vector<16x4xf32>
    %49 = vector.extract_strided_slice %33 {offsets = [2, 0, 0], sizes = [1, 4, 128], strides = [1, 1, 1]} : vector<8x4x128xf32> to vector<1x4x128xf32>
    %50 = vector.shape_cast %49 : vector<1x4x128xf32> to vector<4x128xf32>
    %cst_26 = arith.constant dense<0.000000e+00> : vector<16x128xf32>
    %51 = tpu.matmul %48, %50, %cst_26 {dimension_numbers = #tpu.dot_dimension_numbers<[1], [0], [0], [1], [0, 0, 1, 1], [], []>} : vector<16x4xf32>, vector<4x128xf32>, vector<16x128xf32> -> vector<16x128xf32>
    %52 = arith.addf %46, %51 : vector<16x128xf32>
    %53 = vector.extract_strided_slice %32 {offsets = [3, 0, 0], sizes = [1, 16, 4], strides = [1, 1, 1]} : vector<8x16x4xf32> to vector<1x16x4xf32>
    %54 = vector.shape_cast %53 : vector<1x16x4xf32> to vector<16x4xf32>
    %55 = vector.extract_strided_slice %33 {offsets = [3, 0, 0], sizes = [1, 4, 128], strides = [1, 1, 1]} : vector<8x4x128xf32> to vector<1x4x128xf32>
    %56 = vector.shape_cast %55 : vector<1x4x128xf32> to vector<4x128xf32>
    %cst_27 = arith.constant dense<0.000000e+00> : vector<16x128xf32>
    %57 = tpu.matmul %54, %56, %cst_27 {dimension_numbers = #tpu.dot_dimension_numbers<[1], [0], [0], [1], [0, 0, 1, 1], [], []>} : vector<16x4xf32>, vector<4x128xf32>, vector<16x128xf32> -> vector<16x128xf32>
    %58 = arith.addf %52, %57 : vector<16x128xf32>
    %59 = vector.extract_strided_slice %32 {offsets = [4, 0, 0], sizes = [1, 16, 4], strides = [1, 1, 1]} : vector<8x16x4xf32> to vector<1x16x4xf32>
    %60 = vector.shape_cast %59 : vector<1x16x4xf32> to vector<16x4xf32>
    %61 = vector.extract_strided_slice %33 {offsets = [4, 0, 0], sizes = [1, 4, 128], strides = [1, 1, 1]} : vector<8x4x128xf32> to vector<1x4x128xf32>
    %62 = vector.shape_cast %61 : vector<1x4x128xf32> to vector<4x128xf32>
    %cst_28 = arith.constant dense<0.000000e+00> : vector<16x128xf32>
    %63 = tpu.matmul %60, %62, %cst_28 {dimension_numbers = #tpu.dot_dimension_numbers<[1], [0], [0], [1], [0, 0, 1, 1], [], []>} : vector<16x4xf32>, vector<4x128xf32>, vector<16x128xf32> -> vector<16x128xf32>
    %64 = arith.addf %58, %63 : vector<16x128xf32>
    %65 = vector.extract_strided_slice %32 {offsets = [5, 0, 0], sizes = [1, 16, 4], strides = [1, 1, 1]} : vector<8x16x4xf32> to vector<1x16x4xf32>
    %66 = vector.shape_cast %65 : vector<1x16x4xf32> to vector<16x4xf32>
    %67 = vector.extract_strided_slice %33 {offsets = [5, 0, 0], sizes = [1, 4, 128], strides = [1, 1, 1]} : vector<8x4x128xf32> to vector<1x4x128xf32>
    %68 = vector.shape_cast %67 : vector<1x4x128xf32> to vector<4x128xf32>
    %cst_29 = arith.constant dense<0.000000e+00> : vector<16x128xf32>
    %69 = tpu.matmul %66, %68, %cst_29 {dimension_numbers = #tpu.dot_dimension_numbers<[1], [0], [0], [1], [0, 0, 1, 1], [], []>} : vector<16x4xf32>, vector<4x128xf32>, vector<16x128xf32> -> vector<16x128xf32>
    %70 = arith.addf %64, %69 : vector<16x128xf32>
    %71 = vector.extract_strided_slice %32 {offsets = [6, 0, 0], sizes = [1, 16, 4], strides = [1, 1, 1]} : vector<8x16x4xf32> to vector<1x16x4xf32>
    %72 = vector.shape_cast %71 : vector<1x16x4xf32> to vector<16x4xf32>
    %73 = vector.extract_strided_slice %33 {offsets = [6, 0, 0], sizes = [1, 4, 128], strides = [1, 1, 1]} : vector<8x4x128xf32> to vector<1x4x128xf32>
    %74 = vector.shape_cast %73 : vector<1x4x128xf32> to vector<4x128xf32>
    %cst_30 = arith.constant dense<0.000000e+00> : vector<16x128xf32>
    %75 = tpu.matmul %72, %74, %cst_30 {dimension_numbers = #tpu.dot_dimension_numbers<[1], [0], [0], [1], [0, 0, 1, 1], [], []>} : vector<16x4xf32>, vector<4x128xf32>, vector<16x128xf32> -> vector<16x128xf32>
    %76 = arith.addf %70, %75 : vector<16x128xf32>
    %77 = vector.extract_strided_slice %32 {offsets = [7, 0, 0], sizes = [1, 16, 4], strides = [1, 1, 1]} : vector<8x16x4xf32> to vector<1x16x4xf32>
    %78 = vector.shape_cast %77 : vector<1x16x4xf32> to vector<16x4xf32>
    %79 = vector.extract_strided_slice %33 {offsets = [7, 0, 0], sizes = [1, 4, 128], strides = [1, 1, 1]} : vector<8x4x128xf32> to vector<1x4x128xf32>
    %80 = vector.shape_cast %79 : vector<1x4x128xf32> to vector<4x128xf32>
    %cst_31 = arith.constant dense<0.000000e+00> : vector<16x128xf32>
    %81 = tpu.matmul %78, %80, %cst_31 {dimension_numbers = #tpu.dot_dimension_numbers<[1], [0], [0], [1], [0, 0, 1, 1], [], []>} : vector<16x4xf32>, vector<4x128xf32>, vector<16x128xf32> -> vector<16x128xf32>
    %82 = arith.addf %76, %81 : vector<16x128xf32>
    %c0_32 = arith.constant 0 : index
    %c0_33 = arith.constant 0 : index
    %83 = vector.load %arg7[%c0_32, %c0_33] : memref<1x128xf32, #tpu.memory_space<vmem>>, vector<1x128xf32>
    %84 = vector.broadcast %83 : vector<1x128xf32> to vector<16x128xf32>
    %85 = arith.addf %82, %84 : vector<16x128xf32>
    %86 = vector.shape_cast %85 : vector<16x128xf32> to vector<2x8x128xf32>
    %c0_34 = arith.constant 0 : index
    %c0_35 = arith.constant 0 : index
    %c0_36 = arith.constant 0 : index
    %87 = vector.load %arg8[%c0_34, %c0_35, %c0_36] : memref<2x8x128xf32, #tpu.memory_space<vmem>>, vector<2x8x128xf32>
    tpu.vector_store %arg8[%c0_34, %c0_35, %c0_36], %86 {strides = array<i32>} : memref<2x8x128xf32, #tpu.memory_space<vmem>>, vector<2x8x128xf32>,
    return
  }
}

</mosaic_0001>

<bundles_post_ra>
// kernel: tpu_custom_call.1
= control target key start
LH: loop header
LB: loop body
LE: loop exit
PB: predicated region body
PF: predicated region fallthrough
CT: control target
= control target key end

     0   :  { %13 = vsyncpa [#allocation3], 0  ;;  %s7294_s0 = inlined_call_operand.hbm [shape: f32[2,8,32], index: 0, kind: input, shape index: {}]   ;;  %s7295_s1 = inlined_call_operand.hbm [shape: f32[2,8,32], index: 1, kind: input, shape index: {}]   ;;  %s7296_s2 = inlined_call_operand.hbm [shape: f32[2,8,32], index: 2, kind: input, shape index: {}]   ;;  %s7297_s3 = inlined_call_operand.hbm [shape: f32[32,32], index: 3, kind: input, shape index: {}]   ;;  %s7298_s4 = inlined_call_operand.hbm [shape: f32[32,32], index: 4, kind: input, shape index: {}]   ;;  %s7299_s5 = inlined_call_operand.hbm [shape: f32[32,32], index: 5, kind: input, shape index: {}]   ;;  %s7300_s6 = inlined_call_operand.hbm [shape: f32[8,4,128], index: 6, kind: input, shape index: {}]   ;;  %s7301_s7 = inlined_call_operand.vmem [shape: f32[1,128], index: 7, kind: input, shape index: {}]   ;;  %s7302_s8 = inlined_call_operand.hbm [shape: f32[2,8,128], index: 8, kind: output, shape index: {}]  }
   0x1   :  { %14 = vsyncpa [#allocation6], 0 }
   0x2   :  { %15 = vsyncpa [#allocation9], 0 }
   0x3   :  { %16 = vsyncpa [#allocation12], 0 }
   0x4   :  { %17 = vsyncpa [#allocation4], 0  ;;  %s6214_s27 = smov [#allocation5]   ;;  %s6215_s29 = smov [#allocation8]  }
   0x5   :  { %s35_s28 = sshll.u32 %s6214_s27, 4  ;;  %s59_s30 = sshll.u32 %s6215_s29, 4  ;;  %s36_s28 = int_to_ptr.vmem [resolvable:$true] %s35_s28  ;;  %s6282_s30 = int_to_ptr.vmem [resolvable:$true] %s59_s30 }
   0x6   :  { %s6028_s11 = scalar_lea.hbm %s7295_s1, 256 }
   0x7   :  { %p6029_p0 = scmp.ne.s32.totalorder %s7295_s1, %s6028_s11  ;;  %p6032_p1 = scmp.lt.u32.totalorder %s6028_s11, %s7295_s1 }
   0x9   :  { %p6034_p2 = pnand %p6032_p1, %p6029_p0 }
   0xb   :  { %6037 = shalt.err (!%p6034_p2)
}
   0xc   :  { %s6038_s16 = scalar_lea.vmem %s36_s28, 256  ;;  %p6043_p4 = scmp.lt.s32.totalorder %s36_s28, %s36_s28 }
   0xd   :  { %p6039_p3 = scmp.ne.s32.totalorder %s36_s28, %s6038_s16  ;;  %p6044_p5 = scmp.lt.s32.totalorder %s6038_s16, %s6038_s16 }
   0xf   :  { %p6045_p6 = por %p6044_p5, %p6043_p4 }
  0x11   :  { %p6046_p7 = pnand %p6045_p6, %p6039_p3 }
  0x13   :  { %6049 = shalt.err (!%p6046_p7)
}
  0x14   :  { %s6216_s17 = smov 128   ;;  %s6217_s18 = smov 8  }
  0x15   :  { %41 = dma.hbm_to_vmem [thread:$0]  %s7295_s1, 256, %s36_s28, [#allocation6], %s6216_s17, %s6216_s17, %s6217_s18  }
  0x16   :  { %s6050_s23 = scalar_lea.hbm %s7297_s3, 512 }
  0x17   :  { %p6051_p8 = scmp.ne.s32.totalorder %s7297_s3, %s6050_s23  ;;  %p6054_p9 = scmp.lt.u32.totalorder %s6050_s23, %s7297_s3 }
  0x19   :  { %p6056_p10 = pnand %p6054_p9, %p6051_p8 }
  0x1b   :  { %6059 = shalt.err (!%p6056_p10)
}
  0x1c   :  { %s6060_s29 = scalar_lea.vmem %s6282_s30, 512  ;;  %p6065_p12 = scmp.lt.s32.totalorder %s6282_s30, %s6282_s30 }
  0x1d   :  { %p6061_p11 = scmp.ne.s32.totalorder %s6282_s30, %s6060_s29  ;;  %p6066_p13 = scmp.lt.s32.totalorder %s6060_s29, %s6060_s29 }
  0x1f   :  { %p6067_p0 = por %p6066_p13, %p6065_p12 }
  0x21   :  { %p6068_p1 = pnand %p6067_p0, %p6061_p11 }
  0x23   :  { %6071 = shalt.err (!%p6068_p1)
}
  0x24   :  { %65 = dma.hbm_to_vmem [thread:$0]  %s7297_s3, 512, %s6282_s30, [#allocation9], %s6216_s17, %s6216_s17, %s6217_s18  }
  0x25   :  { %s6218_s9 = smov [#allocation11]   ;;  %s6219_s11 = smov [#allocation2]  }
  0x26   :  { %s83_s10 = sshll.u32 %s6218_s9, 4  ;;  %s23_s12 = sshll.u32 %s6219_s11, 4  ;;  %s84_s10 = int_to_ptr.vmem [resolvable:$true] %s83_s10  ;;  %s6319_s12 = int_to_ptr.vmem [resolvable:$true] %s23_s12 }
  0x27   :  { %s6072_s15 = scalar_lea.hbm %s7299_s5, 512 }
  0x28   :  { %p6073_p2 = scmp.ne.s32.totalorder %s7299_s5, %s6072_s15  ;;  %p6076_p3 = scmp.lt.u32.totalorder %s6072_s15, %s7299_s5 }
  0x2a   :  { %p6078_p4 = pnand %p6076_p3, %p6073_p2 }
  0x2c   :  { %6081 = shalt.err (!%p6078_p4)
}
  0x2d   :  { %s6082_s3 = scalar_lea.vmem %s84_s10, 512  ;;  %p6087_p6 = scmp.lt.s32.totalorder %s84_s10, %s84_s10 }
  0x2e   :  { %p6083_p5 = scmp.ne.s32.totalorder %s84_s10, %s6082_s3  ;;  %p6088_p7 = scmp.lt.s32.totalorder %s6082_s3, %s6082_s3 }
  0x30   :  { %p6089_p8 = por %p6088_p7, %p6087_p6 }
  0x32   :  { %p6090_p9 = pnand %p6089_p8, %p6083_p5 }
  0x34   :  { %6093 = shalt.err (!%p6090_p9)
}
  0x35   :  { %89 = dma.hbm_to_vmem [thread:$0]  %s7299_s5, 512, %s84_s10, [#allocation12], %s6216_s17, %s6216_s17, %s6217_s18  }
  0x36   :  { %s6094_s25 = scalar_lea.hbm %s7294_s0, 256 }
  0x37   :  { %p6095_p10 = scmp.ne.s32.totalorder %s7294_s0, %s6094_s25  ;;  %p6098_p11 = scmp.lt.u32.totalorder %s6094_s25, %s7294_s0 }
  0x39   :  { %p6100_p12 = pnand %p6098_p11, %p6095_p10 }
  0x3b   :  { %6103 = shalt.err (!%p6100_p12)
}
  0x3c   :  { %s6104_s28 = scalar_lea.vmem %s6319_s12, 256  ;;  %p6109_p0 = scmp.lt.s32.totalorder %s6319_s12, %s6319_s12 }
  0x3d   :  { %p6105_p13 = scmp.ne.s32.totalorder %s6319_s12, %s6104_s28  ;;  %p6110_p1 = scmp.lt.s32.totalorder %s6104_s28, %s6104_s28 }
  0x3f   :  { %p6111_p2 = por %p6110_p1, %p6109_p0 }
  0x41   :  { %p6112_p3 = pnand %p6111_p2, %p6105_p13 }
  0x43   :  { %6115 = shalt.err (!%p6112_p3)
}
  0x44   :  { %29 = dma.hbm_to_vmem [thread:$0]  %s7294_s0, 256, %s6319_s12, [#allocation3], %s6216_s17, %s6216_s17, %s6217_s18  }
  0x45   :  { %s6220_s10 = smov [#allocation7]   ;;  %s6221_s13 = smov [#allocation10]  }
  0x46   :  { %s47_s11 = sshll.u32 %s6220_s10, 4  ;;  %s71_s14 = sshll.u32 %s6221_s13, 4  ;;  %s48_s11 = int_to_ptr.vmem [resolvable:$true] %s47_s11  ;;  %s6356_s14 = int_to_ptr.vmem [resolvable:$true] %s71_s14 }
  0x47   :  { %s6116_s19 = scalar_lea.hbm %s7296_s2, 256 }
  0x48   :  { %p6117_p4 = scmp.ne.s32.totalorder %s7296_s2, %s6116_s19  ;;  %p6120_p5 = scmp.lt.u32.totalorder %s6116_s19, %s7296_s2 }
  0x4a   :  { %p6122_p6 = pnand %p6120_p5, %p6117_p4 }
  0x4c   :  { %6125 = shalt.err (!%p6122_p6)
}
  0x4d   :  { %s6126_s0 = scalar_lea.vmem %s48_s11, 256  ;;  %p6131_p8 = scmp.lt.s32.totalorder %s48_s11, %s48_s11 }
  0x4e   :  { %p6127_p7 = scmp.ne.s32.totalorder %s48_s11, %s6126_s0  ;;  %p6132_p9 = scmp.lt.s32.totalorder %s6126_s0, %s6126_s0 }
  0x50   :  { %p6133_p10 = por %p6132_p9, %p6131_p8 }
  0x52   :  { %p6134_p11 = pnand %p6133_p10, %p6127_p7 }
  0x54   :  { %6137 = shalt.err (!%p6134_p11)
}
  0x55   :  { %53 = dma.hbm_to_vmem [thread:$0]  %s7296_s2, 256, %s48_s11, [#allocation6], %s6216_s17, %s6216_s17, %s6217_s18  }
  0x56   :  { %s6138_s25 = scalar_lea.hbm %s7298_s4, 512 }
  0x57   :  { %p6139_p12 = scmp.ne.s32.totalorder %s7298_s4, %s6138_s25  ;;  %p6142_p13 = scmp.lt.u32.totalorder %s6138_s25, %s7298_s4 }
  0x59   :  { %p6144_p0 = pnand %p6142_p13, %p6139_p12 }
  0x5b   :  { %6147 = shalt.err (!%p6144_p0)
}
  0x5c   :  { %s6148_s28 = scalar_lea.vmem %s6356_s14, 512  ;;  %p6153_p2 = scmp.lt.s32.totalorder %s6356_s14, %s6356_s14 }
  0x5d   :  { %p6149_p1 = scmp.ne.s32.totalorder %s6356_s14, %s6148_s28  ;;  %p6154_p3 = scmp.lt.s32.totalorder %s6148_s28, %s6148_s28 }
  0x5f   :  { %p6155_p4 = por %p6154_p3, %p6153_p2 }
  0x61   :  { %p6156_p5 = pnand %p6155_p4, %p6149_p1 }
  0x63   :  { %6159 = shalt.err (!%p6156_p5)
}
  0x64   :  { %77 = dma.hbm_to_vmem [thread:$0]  %s7298_s4, 512, %s6356_s14, [#allocation9], %s6216_s17, %s6216_s17, %s6217_s18  }
  0x65   :  { %s6222_s9 = smov [#allocation13]   ;;  %s6160_s15 = scalar_lea.hbm %s7300_s6, 512 }
  0x66   :  { %s95_s10 = sshll.u32 %s6222_s9, 4  ;;  %p6161_p6 = scmp.ne.s32.totalorder %s7300_s6, %s6160_s15  ;;  %s96_s10 = int_to_ptr.vmem [resolvable:$true] %s95_s10 }
  0x67   :  { %p6164_p7 = scmp.lt.u32.totalorder %s6160_s15, %s7300_s6 }
  0x69   :  { %p6166_p8 = pnand %p6164_p7, %p6161_p6 }
  0x6b   :  { %6169 = shalt.err (!%p6166_p8)
}
  0x6c   :  { %s6170_s3 = scalar_lea.vmem %s96_s10, 512  ;;  %p6175_p10 = scmp.lt.s32.totalorder %s96_s10, %s96_s10 }
  0x6d   :  { %p6171_p9 = scmp.ne.s32.totalorder %s96_s10, %s6170_s3  ;;  %p6176_p11 = scmp.lt.s32.totalorder %s6170_s3, %s6170_s3 }
  0x6f   :  { %p6177_p12 = por %p6176_p11, %p6175_p10 }
  0x71   :  { %p6178_p13 = pnand %p6177_p12, %p6171_p9 }
  0x73   :  { %6181 = shalt.err (!%p6178_p13)
}
  0x74   :  { %s6223_s4 = smov 64   ;;  %s6224_s14 = smov 4  }
  0x75   :  { %101 = dma.hbm_to_vmem [thread:$0]  %s7300_s6, 512, %s96_s10, [#allocation12], %s6223_s4, %s6223_s4, %s6224_s14  }
  0x76   :  { %6204 = dma.done.wait [#allocation3], 256  }
  0x77   :  { %6205 = vsyncadd [#allocation3], 4294967040 }
  0x78   :  { %6206 = dma.done.wait [#allocation6], 512  }
  0x79   :  { %6207 = vsyncadd [#allocation6], 4294966784 }
  0x7a   :  { %6208 = dma.done.wait [#allocation9], 1024  }
  0x7b   :  { %6209 = vsyncadd [#allocation9], 4294966272 }
  0x7c   :  { %6210 = dma.done.wait [#allocation12], 1024  }
  0x7d   :  { %6211 = vsyncadd [#allocation12], 4294966272  ;;  %vm135_vm0 = vcmask 261120   ;;  %v131_v0 = vld [vmem:[#allocation8] sm:$0xff]  ;;  %v132_v1 = vld [vmem:[#allocation8 + $0x8] sm:$0xff]  ;;  %s6225_s6 = smov 120   ;;  %v436_v33 = vlaneseq }
  0x7e   :  { %v133_v2 = vld [vmem:[#allocation8 + $0x10] sm:$0xff]  ;;  %v5903_v3 = vpack.c.bf16 %v132_v1, %v131_v0  ;;  %v134_v4 = vld [vmem:[#allocation8 + $0x18] sm:$0xff]  ;;  %v217_v7 = vld [vmem:[#allocation10] sm:$0xff]  ;;  %s6226_s12 = smov 124   ;;  %s6227_s22 = smov 116   ;;  %v6229_v28 = vmov 0.0  }
  0x7f   :  { %v125_v5 = vld [vmem:[#allocation2] sm:$0xff]  ;;  %v5907_v6 = vpack.c.bf16 %v134_v4, %v133_v2  ;;  %v218_v8 = vld [vmem:[#allocation10 + $0x8] sm:$0xff]  ;;  %v220_v11 = vld [vmem:[#allocation10 + $0x18] sm:$0xff]  ;;  %s6228_s23 = smov 108   ;;  %5713 = vmatprep.subr.mxu0 %v6229_v28  ;;  %s6230_s24 = smov 112   ;;  %vm6232_vm1 = vmmov 0  }
  0x80   :  { %5678 = vmatprep.mubr.msk.f32.mxu1 %vm135_vm0, %v125_v5  ;;  %5904 = vmatprep.subr.bf16.mxu1 %v5903_v3  ;;  %v5911_v9 = vpack.c.bf16 %v218_v8, %v217_v7  ;;  %v219_v10 = vld [vmem:[#allocation10 + $0x10] sm:$0xff]  ;;  %v126_v12 = vld [vmem:[#allocation2 + $0x8] sm:$0xff]  ;;  %v127_v14 = vld [vmem:[#allocation5] sm:$0xff]  ;;  %s6231_s25 = smov 100   ;;  %s6233_s26 = smov 104   ;;  %v437_v37 = vshrl.u32 %v436_v33, 7 }
  0x81   :  { %5906 = vmatpush3.bf16.msra.mxu1 %v5903_v3  ;;  %v5915_v13 = vpack.c.bf16 %v220_v11, %v219_v10  ;;  %v128_v15 = vld [vmem:[#allocation5 + $0x8] sm:$0xff]  ;;  %v302_v16 = vld [vmem:[#allocation11] sm:$0xff]  ;;  %v304_v19 = vld [vmem:[#allocation11 + $0x10] sm:$0xff]  ;;  %5715 = vmatprep.mubr.msk.f32.mxu0 %vm6232_vm1, %v6229_v28  ;;  %v6234_v31 = vmov 1983009808   ;;  %vm2151_vm2 = vcmask 31744  }
  0x82   :  { %5908 = vmatprep.subr.bf16.mxu1 %v5907_v6  ;;  %v303_v17 = vld [vmem:[#allocation11 + $0x8] sm:$0xff]  ;;  %v305_v20 = vld [vmem:[#allocation11 + $0x18] sm:$0xff]  ;;  %v129_v22 = vld [vmem:[#allocation7] sm:$0xff]  ;;  %v434_v32 = vunpack.c.l.s4 %v6234_v31  ;;  %v6235_v34 = vmov 1934713408   ;;  %vm3368_vm3 = vcmask 64512  }
  0x83   :  { %v5919_v18 = vpack.c.bf16 %v303_v17, %v302_v16  ;;  %v5923_v21 = vpack.c.bf16 %v305_v20, %v304_v19  ;;  %v130_v23 = vld [vmem:[#allocation7 + $0x8] sm:$0xff]  ;;  %v498_v35 = vunpack.c.l.s4 %v6235_v34  ;;  %vm4727_vm4 = vcmask 1043456   ;;  %s6236_s1 = smov [#allocation14]  }
  0x84   :  { %v435_v36 = vunpack.c.0.s8 %v434_v32  ;;  %s5422_s28 = sshll.u32 %s6236_s1, 4  ;;  %s5423_s28 = int_to_ptr.vmem [resolvable:$true] %s5422_s28 }
  0x85   :  { %5910 = vmatpush3.bf16.msra.mxu1 %v5907_v6  ;;  %v499_v40 = vunpack.c.0.s8 %v498_v35  ;;  %s6182_s2 = scalar_lea.vmem %s5423_s28, 256  ;;  %p6187_p1 = scmp.lt.s32.totalorder %s5423_s28, %s5423_s28 }
  0x86   :  { %5912 = vmatprep.subr.bf16.mxu1 %v5911_v9  ;;  %v6493_v41 = vsub.s32 %v435_v36, %v437_v37  ;;  %p6183_p0 = scmp.ne.s32.totalorder %s5423_s28, %s6182_s2  ;;  %p6188_p2 = scmp.lt.s32.totalorder %s6182_s2, %s6182_s2 }
  0x87   :  { %v6497_v47 = vsub.s32 %v499_v40, %v437_v37 }
  0x88   :  { %5679 = vmatmul.mubr.msk.f32.vlgmr.msra.gmra.mrb[0].mxu1 %vm135_vm0, %v126_v12  ;;  %p6189_p3 = por %p6188_p2, %p6187_p1 }
  0x89   :  { %5914 = vmatpush3.bf16.msra.mxu1 %v5911_v9  ;;  %5689 = vmatprep.mubr.msk.f32.mxu1 %vm135_vm0, %v127_v14 }
  0x8a   :  { %5916 = vmatprep.subr.bf16.mxu1 %v5915_v13  ;;  %p6190_p4 = pnand %p6189_p3, %p6183_p0 }
  0x8d   :  { %5918 = vmatpush3.bf16.msra.mxu1 %v5915_v13 }
  0x8e   :  { %5920 = vmatprep.subr.bf16.mxu1 %v5919_v18 }
  0x90   :  { %5690 = vmatmul.mubr.msk.f32.vlgmr.msra.gmra.mrb[2].mxu1 %vm135_vm0, %v128_v15 }
  0x91   :  { %5922 = vmatpush3.bf16.msra.mxu1 %v5919_v18  ;;  %5700 = vmatprep.mubr.msk.f32.mxu1 %vm135_vm0, %v129_v22 }
  0x92   :  { %5924 = vmatprep.subr.bf16.mxu1 %v5923_v21 }
  0x95   :  { %5926 = vmatpush3.bf16.msra.mxu1 %v5923_v21 }
  0x96   :  { %5703 = vmatprep.subr.mxu1 %v6229_v28 }
  0x98   :  { %5701 = vmatmul.mubr.msk.f32.vlgmr.msra.gmra.mrb[4].mxu1 %vm135_vm0, %v130_v23 }
  0x99   :  { %5705 = vmatprep.mubr.msk.f32.mxu1 %vm6232_vm1, %v6229_v28 }
 0x15b   :  { %v6411_v24 = vpop.f32.mrb[0].mxu1 }
 0x15c   :  { %v6413_v25 = vpop.f32.mrb[1].mxu1 }
 0x15d   :  { %395 = vrot.lane.b32.xlu0 %v6413_v25, %s6225_s6  ;;  %389 = vrot.lane.b32.xlu1 %v6413_v25, %s6226_s12 }
 0x161   :  { %401 = vrot.lane.b32.xlu1 %v6413_v25, %s6227_s22 }
 0x163   :  { %v6421_v26 = vpop.f32.mrb[2].mxu1 }
 0x164   :  { %979 = vrot.lane.b32.xlu0 %v6421_v26, %s6226_s12  ;;  %v6425_v27 = vpop.f32.mrb[3].mxu1 }
 0x165   :  { %985 = vrot.lane.b32.xlu1 %v6421_v26, %s6225_s6 }
 0x168   :  { %977 = vrot.lane.b32.xlu0 %v6425_v27, %s6226_s12 }
 0x169   :  { %989 = vrot.lane.b32.xlu1 %v6425_v27, %s6227_s22 }
 0x16b   :  { %v6481_v29 = vpop.f32.mrb[4].mxu1 }
 0x16c   :  { %983 = vrot.lane.b32.xlu0 %v6425_v27, %s6225_s6  ;;  %v6485_v30 = vpop.f32.mrb[5].mxu1 }
 0x16d   :  { %391 = vrot.lane.b32.xlu1 %v6411_v24, %s6226_s12 }
 0x170   :  { %991 = vrot.lane.b32.xlu0 %v6421_v26, %s6227_s22 }
 0x171   :  { %403 = vrot.lane.b32.xlu1 %v6411_v24, %s6227_s22 }
 0x174   :  { %397 = vrot.lane.b32.xlu0 %v6411_v24, %s6225_s6 }
 0x175   :  { %1003 = vrot.lane.b32.xlu1 %v6421_v26, %s6228_s23 }
 0x178   :  { %997 = vrot.lane.b32.xlu0 %v6421_v26, %s6230_s24 }
 0x179   :  { %1015 = vrot.lane.b32.xlu1 %v6421_v26, %s6231_s25 }
 0x17c   :  { %1009 = vrot.lane.b32.xlu0 %v6421_v26, %s6233_s26 }
 0x17d   :  { %413 = vrot.lane.b32.xlu1 %v6413_v25, %s6228_s23 }
 0x180   :  { %407 = vrot.lane.b32.xlu0 %v6413_v25, %s6230_s24 }
 0x181   :  { %425 = vrot.lane.b32.xlu1 %v6413_v25, %s6231_s25 }
 0x184   :  { %419 = vrot.lane.b32.xlu0 %v6413_v25, %s6233_s26 }
 0x185   :  { %415 = vrot.lane.b32.xlu1 %v6411_v24, %s6228_s23 }
 0x188   :  { %409 = vrot.lane.b32.xlu0 %v6411_v24, %s6230_s24 }
 0x189   :  { %1001 = vrot.lane.b32.xlu1 %v6425_v27, %s6228_s23 }
 0x18c   :  { %995 = vrot.lane.b32.xlu0 %v6425_v27, %s6230_s24 }
 0x18d   :  { %1013 = vrot.lane.b32.xlu1 %v6425_v27, %s6231_s25 }
 0x190   :  { %1007 = vrot.lane.b32.xlu0 %v6425_v27, %s6233_s26 }
 0x191   :  { %427 = vrot.lane.b32.xlu1 %v6411_v24, %s6231_s25 }
 0x194   :  { %421 = vrot.lane.b32.xlu0 %v6411_v24, %s6233_s26 }
 0x195   :  { %1567 = vrot.lane.b32.xlu1 %v6481_v29, %s6226_s12 }
 0x198   :  { %1571 = vrot.lane.b32.xlu0 %v6485_v30, %s6225_s6 }
 0x199   :  { %1565 = vrot.lane.b32.xlu1 %v6485_v30, %s6226_s12 }
 0x19d   :  { %1577 = vrot.lane.b32.xlu1 %v6485_v30, %s6227_s22 }
 0x1cf   :  { %v396_v38 = vpop.permute.xlu0 %395  ;;  %v390_v39 = vpop.permute.xlu1 %389 }
 0x1d0   :  { %v431_v42 = vcombine.low %v6413_v25, %v396_v38  ;;  %v432_v43 = vcombine.high %v6413_v25, %v396_v38 }
 0x1d2   :  { %v439_v48 = vrot.slane %v431_v42, %v6493_v41  ;;  %v446_v49 = vrot.slane %v432_v43, %v6493_v41 }
 0x1d3   :  { %v402_v44 = vpop.permute.xlu1 %401 }
 0x1d4   :  { %v447_v45 = vcombine.low %v390_v39, %v402_v44  ;;  %v448_v46 = vcombine.high %v390_v39, %v402_v44 }
 0x1d6   :  { %v455_v50 = vrot.slane %v447_v45, %v6493_v41  ;;  %v462_v51 = vrot.slane %v448_v46, %v6493_v41  ;;  %v980_v52 = vpop.permute.xlu0 %979 }
 0x1d7   :  { %v986_v53 = vpop.permute.xlu1 %985 }
 0x1d8   :  { %v495_v54 = vcombine.low %v439_v48, %v455_v50  ;;  %v496_v55 = vcombine.high %v439_v48, %v455_v50  ;;  %v511_v56 = vcombine.low %v446_v49, %v462_v51  ;;  %v512_v57 = vcombine.high %v446_v49, %v462_v51 }
 0x1d9   :  { %v1155_v8 = vcombine.low %v6421_v26, %v986_v53  ;;  %v1156_v9 = vcombine.high %v6421_v26, %v986_v53 }
 0x1da   :  { %v503_v58 = vrot.slane %v495_v54, %v6497_v47  ;;  %v510_v59 = vrot.slane %v496_v55, %v6497_v47  ;;  %v519_v60 = vrot.slane %v511_v56, %v6497_v47  ;;  %v526_v61 = vrot.slane %v512_v57, %v6497_v47  ;;  %v978_v62 = vpop.permute.xlu0 %977 }
 0x1db   :  { %v990_v63 = vpop.permute.xlu1 %989  ;;  %v1163_v22 = vrot.slane %v1155_v8, %v6493_v41  ;;  %v1170_v23 = vrot.slane %v1156_v9, %v6493_v41 }
 0x1dc   :  { %v5443_v0 = vcombine.low %v503_v58, %v510_v59  ;;  %v5445_v1 = vcombine.high %v503_v58, %v510_v59  ;;  %v5447_v2 = vcombine.low %v519_v60, %v526_v61  ;;  %v5449_v3 = vcombine.high %v519_v60, %v526_v61 }
 0x1dd   :  { %v1035_v4 = vcombine.low %v978_v62, %v990_v63  ;;  %v1036_v5 = vcombine.high %v978_v62, %v990_v63 }
 0x1de   :  { %v711_v6 = vrot.slane %v5443_v0, %v6493_v41  ;;  %v727_v7 = vrot.slane %v5445_v1, %v6493_v41  ;;  %v984_v10 = vpop.permute.xlu0 %983  ;;  %v743_v14 = vrot.slane %v5447_v2, %v6493_v41  ;;  %v759_v15 = vrot.slane %v5449_v3, %v6493_v41 }
 0x1df   :  { %v1019_v11 = vcombine.low %v6425_v27, %v984_v10  ;;  %v1020_v12 = vcombine.high %v6425_v27, %v984_v10  ;;  %v6513_v13 = vpop.permute.xlu1 %391  ;;  %v1043_v16 = vrot.slane %v1035_v4, %v6493_v41  ;;  %v1050_v17 = vrot.slane %v1036_v5, %v6493_v41 }
 0x1e0   :  { %v767_v20 = vcombine.low %v711_v6, %v727_v7  ;;  %v768_v21 = vcombine.high %v711_v6, %v727_v7  ;;  %v799_v34 = vcombine.low %v743_v14, %v759_v15  ;;  %v800_v35 = vcombine.high %v743_v14, %v759_v15 }
 0x1e1   :  { %v1027_v18 = vrot.slane %v1019_v11, %v6493_v41  ;;  %v1034_v19 = vrot.slane %v1020_v12, %v6493_v41 }
 0x1e2   :  { %v992_v25 = vpop.permute.xlu0 %991  ;;  %v6548_v4 = vrot.slane %v767_v20, %v6497_v47  ;;  %v6551_v5 = vrot.slane %v799_v34, %v6497_v47  ;;  %v6554_v6 = vrot.slane %v768_v21, %v6497_v47  ;;  %v6557_v7 = vrot.slane %v800_v35, %v6497_v47 }
 0x1e3   :  { %v1083_v26 = vcombine.low %v1027_v18, %v1043_v16  ;;  %v1084_v27 = vcombine.high %v1027_v18, %v1043_v16  ;;  %v1099_v31 = vcombine.low %v1034_v19, %v1050_v17  ;;  %v1100_v32 = vcombine.high %v1034_v19, %v1050_v17  ;;  %v404_v33 = vpop.permute.xlu1 %403 }
 0x1e4   :  { %v1171_v36 = vcombine.low %v980_v52, %v992_v25  ;;  %v1172_v37 = vcombine.high %v980_v52, %v992_v25  ;;  %v583_v45 = vcombine.low %v6513_v13, %v404_v33  ;;  %v584_v46 = vcombine.high %v6513_v13, %v404_v33 }
 0x1e5   :  { %v1091_v38 = vrot.slane %v1083_v26, %v6497_v47  ;;  %v1098_v39 = vrot.slane %v1084_v27, %v6497_v47  ;;  %v1107_v40 = vrot.slane %v1099_v31, %v6497_v47  ;;  %v1114_v42 = vrot.slane %v1100_v32, %v6497_v47 }
 0x1e6   :  { %v1179_v43 = vrot.slane %v1171_v36, %v6493_v41  ;;  %v1186_v44 = vrot.slane %v1172_v37, %v6493_v41  ;;  %v398_v48 = vpop.permute.xlu0 %397  ;;  %v591_v18 = vrot.slane %v583_v45, %v6493_v41  ;;  %v598_v19 = vrot.slane %v584_v46, %v6493_v41 }
 0x1e7   :  { %v5459_v49 = vcombine.low %v1091_v38, %v1098_v39  ;;  %v5461_v50 = vcombine.high %v1091_v38, %v1098_v39  ;;  %v5463_v51 = vcombine.low %v1107_v40, %v1114_v42  ;;  %v5465_v52 = vcombine.high %v1107_v40, %v1114_v42  ;;  %v1004_v53 = vpop.permute.xlu1 %1003 }
 0x1e8   :  { %v1219_v54 = vcombine.low %v1163_v22, %v1179_v43  ;;  %v1220_v55 = vcombine.high %v1163_v22, %v1179_v43  ;;  %v1235_v56 = vcombine.low %v1170_v23, %v1186_v44  ;;  %v1236_v57 = vcombine.high %v1170_v23, %v1186_v44 }
 0x1e9   :  { %v6532_v58 = vrot.slane %v5459_v49, %v6493_v41  ;;  %v6535_v59 = vrot.slane %v5461_v50, %v6493_v41  ;;  %v6538_v60 = vrot.slane %v5463_v51, %v6493_v41  ;;  %v6541_v61 = vrot.slane %v5465_v52, %v6493_v41 }
 0x1ea   :  { %v1227_v62 = vrot.slane %v1219_v54, %v6497_v47  ;;  %v1234_v63 = vrot.slane %v1220_v55, %v6497_v47  ;;  %v1243_v0 = vrot.slane %v1235_v56, %v6497_v47  ;;  %v1250_v1 = vrot.slane %v1236_v57, %v6497_v47  ;;  %v998_v2 = vpop.permute.xlu0 %997 }
 0x1eb   :  { %v1016_v3 = vpop.permute.xlu1 %1015  ;;  %v567_v12 = vcombine.low %v6411_v24, %v398_v48  ;;  %v568_v13 = vcombine.high %v6411_v24, %v398_v48  ;;  %v1355_v16 = vcombine.low %v6532_v58, %v6535_v59  ;;  %v1387_v17 = vcombine.low %v6538_v60, %v6541_v61 }
 0x1ec   :  { %v5467_v8 = vcombine.low %v1227_v62, %v1234_v63  ;;  %v5469_v9 = vcombine.high %v1227_v62, %v1234_v63  ;;  %v5471_v10 = vcombine.low %v1243_v0, %v1250_v1  ;;  %v5473_v11 = vcombine.high %v1243_v0, %v1250_v1 }
 0x1ed   :  { %v1203_v14 = vcombine.low %v1004_v53, %v1016_v3  ;;  %v1204_v15 = vcombine.high %v1004_v53, %v1016_v3  ;;  %v575_v24 = vrot.slane %v567_v12, %v6493_v41  ;;  %v582_v23 = vrot.slane %v568_v13, %v6493_v41 }
 0x1ee   :  { %v1010_v20 = vpop.permute.xlu0 %1009  ;;  %v6568_v21 = vrot.slane %v5467_v8, %v6493_v41  ;;  %v6571_v22 = vrot.slane %v5469_v9, %v6493_v41  ;;  %v6578_v26 = vrot.slane %v5471_v10, %v6493_v41  ;;  %v6581_v27 = vrot.slane %v5473_v11, %v6493_v41 }
 0x1ef   :  { %v6575_v25 = vpop.permute.xlu1 %413  ;;  %v1211_v31 = vrot.slane %v1203_v14, %v6493_v41  ;;  %v1218_v32 = vrot.slane %v1204_v15, %v6493_v41  ;;  %v631_v33 = vcombine.low %v575_v24, %v591_v18  ;;  %v632_v34 = vcombine.high %v575_v24, %v591_v18 }
 0x1f0   :  { %v647_v35 = vcombine.low %v582_v23, %v598_v19  ;;  %v648_v36 = vcombine.high %v582_v23, %v598_v19  ;;  %v1187_v37 = vcombine.low %v998_v2, %v1010_v20  ;;  %v1188_v38 = vcombine.high %v998_v2, %v1010_v20 }
 0x1f1   :  { %v1363_v39 = vrot.slane %v1355_v16, %v6497_v47  ;;  %v1395_v40 = vrot.slane %v1387_v17, %v6497_v47  ;;  %v639_v43 = vrot.slane %v631_v33, %v6497_v47  ;;  %v646_v44 = vrot.slane %v632_v34, %v6497_v47 }
 0x1f2   :  { %v6587_v42 = vpop.permute.xlu0 %407  ;;  %v655_v45 = vrot.slane %v647_v35, %v6497_v47  ;;  %v662_v46 = vrot.slane %v648_v36, %v6497_v47  ;;  %v1195_v49 = vrot.slane %v1187_v37, %v6493_v41  ;;  %v1202_v50 = vrot.slane %v1188_v38, %v6493_v41 }
 0x1f3   :  { %v6593_v48 = vpop.permute.xlu1 %425  ;;  %v1419_v51 = vcombine.low %v1363_v39, %v1395_v40  ;;  %v1420_v52 = vcombine.high %v1363_v39, %v1395_v40  ;;  %v5451_v53 = vcombine.low %v639_v43, %v646_v44  ;;  %v5453_v54 = vcombine.high %v639_v43, %v646_v44 }
 0x1f4   :  { %v5455_v55 = vcombine.low %v655_v45, %v662_v46  ;;  %v5457_v56 = vcombine.high %v655_v45, %v662_v46  ;;  %v1251_v57 = vcombine.low %v1195_v49, %v1211_v31  ;;  %v1252_v62 = vcombine.high %v1195_v49, %v1211_v31 }
 0x1f5   :  { %v1267_v63 = vcombine.low %v1202_v50, %v1218_v32  ;;  %v1268_v0 = vcombine.high %v1202_v50, %v1218_v32  ;;  %5704 = vmatpush3.xpose.msk.msra.mxu1 %vm2151_vm2, %v1419_v51  ;;  %v6599_v2 = vrot.slane %v5451_v53, %v6493_v41  ;;  %v6602_v3 = vrot.slane %v5453_v54, %v6493_v41 }
 0x1f6   :  { %v420_v1 = vpop.permute.xlu0 %419  ;;  %v6605_v8 = vrot.slane %v5455_v55, %v6493_v41  ;;  %v6608_v9 = vrot.slane %v5457_v56, %v6493_v41  ;;  %5714 = vmatpush3.xpose.msk.msra.mxu0 %vm2151_vm2, %v1420_v52  ;;  %v1259_v10 = vrot.slane %v1251_v57, %v6497_v47  ;;  %v1266_v11 = vrot.slane %v1252_v62, %v6497_v47 }
 0x1f7   :  { %v1275_v12 = vrot.slane %v1267_v63, %v6497_v47  ;;  %v1282_v13 = vrot.slane %v1268_v0, %v6497_v47  ;;  %5708 = vmatprep.subr.mxu1 %v6229_v28  ;;  %v6616_v14 = vpop.permute.xlu1 %415  ;;  %v1356_v15 = vcombine.high %v6532_v58, %v6535_v59  ;;  %v1388_v16 = vcombine.high %v6538_v60, %v6541_v61 }
 0x1f8   :  { %v1491_v17 = vcombine.low %v6568_v21, %v6571_v22  ;;  %v1492_v18 = vcombine.high %v6568_v21, %v6571_v22  ;;  %5723 = vmatprep.subr.mxu0 %v6229_v28  ;;  %v5468_v19 = vcombine.low %v1259_v10, %v1266_v11  ;;  %v5470_v20 = vcombine.high %v1259_v10, %v1266_v11 }
 0x1f9   :  { %v5472_v24 = vcombine.low %v1275_v12, %v1282_v13  ;;  %v5474_v23 = vcombine.high %v1275_v12, %v1282_v13  ;;  %v1523_v58 = vcombine.low %v6578_v26, %v6581_v27  ;;  %v1524_v59 = vcombine.high %v6578_v26, %v6581_v27 }
 0x1fa   :  { %v6627_v31 = vpop.permute.xlu0 %409  ;;  %v831_v60 = vcombine.low %v6548_v4, %v6551_v5  ;;  %v832_v61 = vcombine.high %v6548_v4, %v6551_v5  ;;  %v903_v21 = vcombine.low %v6599_v2, %v6602_v3  ;;  %v904_v22 = vcombine.high %v6599_v2, %v6602_v3 }
 0x1fb   :  { %v935_v32 = vcombine.low %v6605_v8, %v6608_v9  ;;  %v479_v33 = vcombine.low %v6575_v25, %v6593_v48  ;;  %v936_v26 = vcombine.high %v6605_v8, %v6608_v9  ;;  %v480_v27 = vcombine.high %v6575_v25, %v6593_v48  ;;  %v6666_v25 = vpop.permute.xlu1 %1001 }
 0x1fc   :  { %5706 = vmatmul.mubr.msk.f32.vlgmr.msra.gmra.mrb[6].mxu1 %vm2151_vm2, %v831_v60  ;;  %5716 = vmatmul.mubr.msk.f32.vlgmr.msra.gmra.mrb[0].mxu0 %vm2151_vm2, %v832_v61  ;;  %v1499_v4 = vrot.slane %v1491_v17, %v6497_v47  ;;  %v6653_v5 = vrot.slane %v5468_v19, %v6493_v41  ;;  %v6656_v34 = vrot.slane %v5470_v20, %v6493_v41 }
 0x1fd   :  { %v6659_v35 = vrot.slane %v5472_v24, %v6493_v41  ;;  %v6662_v36 = vrot.slane %v5474_v23, %v6493_v41  ;;  %5725 = vmatprep.mubr.msk.f32.mxu0 %vm6232_vm1, %v6229_v28  ;;  %v1531_v37 = vrot.slane %v1523_v58, %v6497_v47  ;;  %v1370_v38 = vrot.slane %v1356_v15, %v6497_v47 }
 0x1fe   :  { %v1402_v39 = vrot.slane %v1388_v16, %v6497_v47  ;;  %v463_v40 = vcombine.low %v6587_v42, %v420_v1  ;;  %5710 = vmatprep.mubr.msk.f32.mxu1 %vm6232_vm1, %v6229_v28  ;;  %v6674_v43 = vpop.permute.xlu0 %995  ;;  %v487_v44 = vrot.slane %v479_v33, %v6493_v41  ;;  %v464_v45 = vcombine.high %v6587_v42, %v420_v1 }
 0x1ff   :  { %v911_v46 = vrot.slane %v903_v21, %v6497_v47  ;;  %v943_v48 = vrot.slane %v935_v32, %v6497_v47  ;;  %v494_v49 = vrot.slane %v480_v27, %v6493_v41  ;;  %v1555_v50 = vcombine.low %v1499_v4, %v1531_v37  ;;  %v1014_v10 = vpop.permute.xlu1 %1013 }
 0x200   :  { %v1421_v51 = vcombine.low %v1370_v38, %v1402_v39  ;;  %v471_v52 = vrot.slane %v463_v40, %v6493_v41  ;;  %v478_v53 = vrot.slane %v464_v45, %v6493_v41  ;;  %v833_v54 = vcombine.low %v6554_v6, %v6557_v7 }
 0x201   :  { %v967_v55 = vcombine.low %v911_v46, %v943_v48  ;;  %v1556_v56 = vcombine.high %v1499_v4, %v1531_v37  ;;  %5709 = vmatpush3.xpose.msk.msra.mxu1 %vm2151_vm2, %v1555_v50  ;;  %v1422_v62 = vcombine.high %v1370_v38, %v1402_v39  ;;  %v834_v1 = vcombine.high %v6554_v6, %v6557_v7 }
 0x202   :  { %5724 = vmatpush3.xpose.msk.msra.mxu0 %vm2151_vm2, %v1421_v51  ;;  %v527_v42 = vcombine.low %v471_v52, %v487_v44  ;;  %v528_v57 = vcombine.high %v471_v52, %v487_v44  ;;  %v543_v63 = vcombine.low %v478_v53, %v494_v49  ;;  %v544_v0 = vcombine.high %v478_v53, %v494_v49  ;;  %v1008_v16 = vpop.permute.xlu0 %1007 }
 0x203   :  { %5718 = vmatprep.subr.mxu1 %v6229_v28  ;;  %5733 = vmatprep.subr.mxu0 %v6229_v28  ;;  %v1506_v13 = vrot.slane %v1492_v18, %v6497_v47  ;;  %v1538_v15 = vrot.slane %v1524_v59, %v6497_v47  ;;  %v968_v20 = vcombine.high %v911_v46, %v943_v48  ;;  %v428_v4 = vpop.permute.xlu1 %427 }
 0x204   :  { %v535_v11 = vrot.slane %v527_v42, %v6497_v47  ;;  %v542_v12 = vrot.slane %v528_v57, %v6497_v47  ;;  %v551_v17 = vrot.slane %v543_v63, %v6497_v47  ;;  %v558_v19 = vrot.slane %v544_v0, %v6497_v47  ;;  %5711 = vmatmul.mubr.msk.f32.vlgmr.msra.gmra.mrb[8].mxu1 %vm2151_vm2, %v967_v55 }
 0x205   :  { %5726 = vmatmul.mubr.msk.f32.vlgmr.msra.gmra.mrb[2].mxu0 %vm2151_vm2, %v833_v54  ;;  %5719 = vmatpush3.xpose.msk.msra.mxu1 %vm2151_vm2, %v1556_v56  ;;  %v1067_v18 = vcombine.low %v6666_v25, %v1014_v10  ;;  %v1068_v58 = vcombine.high %v6666_v25, %v1014_v10  ;;  %v1557_v61 = vcombine.low %v1506_v13, %v1538_v15 }
 0x206   :  { %v5444_v6 = vcombine.low %v535_v11, %v542_v12  ;;  %v5446_v7 = vcombine.high %v535_v11, %v542_v12  ;;  %5734 = vmatpush3.xpose.msk.msra.mxu0 %vm2151_vm2, %v1422_v62  ;;  %v5448_v24 = vcombine.low %v551_v17, %v558_v19  ;;  %v5450_v23 = vcombine.high %v551_v17, %v558_v19 }
 0x207   :  { %5735 = vmatprep.mubr.msk.f32.mxu0 %vm6232_vm1, %v6229_v28  ;;  %5720 = vmatprep.mubr.msk.f32.mxu1 %vm6232_vm1, %v6229_v28  ;;  %v918_v21 = vrot.slane %v904_v22, %v6497_v47  ;;  %v1507_v32 = vcombine.low %v6653_v5, %v6656_v34  ;;  %v1539_v33 = vcombine.low %v6659_v35, %v6662_v36  ;;  %v422_v22 = vpop.permute.xlu0 %421 }
 0x208   :  { %v6708_v59 = vrot.slane %v5444_v6, %v6493_v41  ;;  %v6711_v60 = vrot.slane %v5446_v7, %v6493_v41  ;;  %5728 = vmatprep.subr.mxu1 %v6229_v28  ;;  %5721 = vmatmul.mubr.msk.f32.vlgmr.msra.gmra.mrb[10].mxu1 %vm2151_vm2, %v968_v20  ;;  %v950_v27 = vrot.slane %v936_v26, %v6497_v47 }
 0x209   :  { %5736 = vmatmul.mubr.msk.f32.vlgmr.msra.gmra.mrb[4].mxu0 %vm2151_vm2, %v834_v1  ;;  %v6729_v25 = vrot.slane %v5448_v24, %v6493_v41  ;;  %v6732_v2 = vrot.slane %v5450_v23, %v6493_v41  ;;  %5729 = vmatpush3.xpose.msk.msra.mxu1 %vm2151_vm2, %v1557_v61  ;;  %v1075_v3 = vrot.slane %v1067_v18, %v6493_v41 }
 0x20a   :  { %5730 = vmatprep.mubr.msk.f32.mxu1 %vm6232_vm1, %v6229_v28  ;;  %v783_v37 = vcombine.low %v6708_v59, %v6711_v60  ;;  %v1082_v8 = vrot.slane %v1068_v58, %v6493_v41  ;;  %5738 = vmatprep.subr.mxu1 %v6229_v28  ;;  %v969_v9 = vcombine.low %v918_v21, %v950_v27 }
 0x20b   :  { %v1051_v26 = vcombine.low %v6674_v43, %v1008_v16  ;;  %v1558_v38 = vcombine.high %v1506_v13, %v1538_v15  ;;  %v1052_v39 = vcombine.high %v6674_v43, %v1008_v16  ;;  %v615_v40 = vcombine.low %v6616_v14, %v428_v4  ;;  %5743 = vmatprep.subr.mxu0 %v6229_v28 }
 0x20c   :  { %v616_v44 = vcombine.high %v6616_v14, %v428_v4  ;;  %5731 = vmatmul.mubr.msk.f32.vlgmr.msra.gmra.mrb[12].mxu1 %vm2151_vm2, %v969_v9  ;;  %v6750_v46 = vrot.slane %v1507_v32, %v6497_v47  ;;  %v6753_v48 = vrot.slane %v1539_v33, %v6497_v47  ;;  %v599_v49 = vcombine.low %v6627_v31, %v422_v22 }
 0x20d   :  { %v1059_v45 = vrot.slane %v1051_v26, %v6493_v41  ;;  %v815_v43 = vcombine.low %v6729_v25, %v6732_v2  ;;  %5739 = vmatpush3.xpose.msk.msra.mxu1 %vm2151_vm2, %v1558_v38  ;;  %v1066_v14 = vrot.slane %v1052_v39, %v6493_v41  ;;  %5740 = vmatprep.mubr.msk.f32.mxu1 %vm6232_vm1, %v6229_v28 }
 0x20e   :  { %v970_v50 = vcombine.high %v918_v21, %v950_v27  ;;  %v623_v53 = vrot.slane %v615_v40, %v6493_v41  ;;  %5748 = vmatprep.subr.mxu1 %v6229_v28  ;;  %v600_v54 = vcombine.high %v6627_v31, %v422_v22  ;;  %v1559_v42 = vcombine.low %v6750_v46, %v6753_v48 }
 0x20f   :  { %v1115_v51 = vcombine.low %v1059_v45, %v1075_v3  ;;  %v1116_v52 = vcombine.high %v1059_v45, %v1075_v3  ;;  %v1131_v55 = vcombine.low %v1066_v14, %v1082_v8  ;;  %v1132_v56 = vcombine.high %v1066_v14, %v1082_v8  ;;  %5745 = vmatprep.mubr.msk.f32.mxu0 %vm6232_vm1, %v6229_v28 }
 0x210   :  { %v607_v57 = vrot.slane %v599_v49, %v6493_v41  ;;  %v630_v0 = vrot.slane %v616_v44, %v6493_v41  ;;  %5741 = vmatmul.mubr.msk.f32.vlgmr.msra.gmra.mrb[14].mxu1 %vm2151_vm2, %v970_v50  ;;  %v614_v31 = vrot.slane %v600_v54, %v6493_v41  ;;  %v791_v45 = vrot.slane %v783_v37, %v6497_v47 }
 0x211   :  { %v1123_v62 = vrot.slane %v1115_v51, %v6497_v47  ;;  %v1130_v63 = vrot.slane %v1116_v52, %v6497_v47  ;;  %v1139_v1 = vrot.slane %v1131_v55, %v6497_v47  ;;  %v1146_v10 = vrot.slane %v1132_v56, %v6497_v47  ;;  %5749 = vmatpush3.xpose.msk.msra.mxu1 %vm2151_vm2, %v1559_v42 }
 0x212   :  { %v663_v11 = vcombine.low %v607_v57, %v623_v53  ;;  %v664_v12 = vcombine.high %v607_v57, %v623_v53  ;;  %v679_v16 = vcombine.low %v614_v31, %v630_v0  ;;  %v680_v17 = vcombine.high %v614_v31, %v630_v0  ;;  %5750 = vmatprep.mubr.msk.f32.mxu1 %vm6232_vm1, %v6229_v28 }
 0x213   :  { %v5460_v13 = vcombine.low %v1123_v62, %v1130_v63  ;;  %v5462_v15 = vcombine.high %v1123_v62, %v1130_v63  ;;  %v5464_v19 = vcombine.low %v1139_v1, %v1146_v10  ;;  %v5466_v20 = vcombine.high %v1139_v1, %v1146_v10  ;;  %5758 = vmatprep.subr.mxu1 %v6229_v28 }
 0x214   :  { %v671_v6 = vrot.slane %v663_v11, %v6497_v47  ;;  %v678_v7 = vrot.slane %v664_v12, %v6497_v47  ;;  %v687_v23 = vrot.slane %v679_v16, %v6497_v47  ;;  %v694_v58 = vrot.slane %v680_v17, %v6497_v47 }
 0x215   :  { %v1306_v18 = vrot.slane %v5460_v13, %v6493_v41  ;;  %v1322_v24 = vrot.slane %v5462_v15, %v6493_v41  ;;  %v1338_v61 = vrot.slane %v5464_v19, %v6493_v41  ;;  %v1354_v21 = vrot.slane %v5466_v20, %v6493_v41  ;;  %v6850_v19 = vpop.permute.xlu1 %1567 }
 0x216   :  { %v5452_v32 = vcombine.low %v671_v6, %v678_v7  ;;  %v5454_v33 = vcombine.high %v671_v6, %v678_v7  ;;  %v5456_v4 = vcombine.low %v687_v23, %v694_v58  ;;  %v5458_v3 = vcombine.high %v687_v23, %v694_v58  ;;  %v1572_v6 = vpop.permute.xlu0 %1571 }
 0x217   :  { %v1371_v27 = vcombine.low %v1306_v18, %v1322_v24  ;;  %v1403_v22 = vcombine.low %v1338_v61, %v1354_v21  ;;  %v823_v49 = vrot.slane %v815_v43, %v6497_v47  ;;  %v1508_v14 = vcombine.high %v6653_v5, %v6656_v34 }
 0x218   :  { %v854_v8 = vrot.slane %v5452_v32, %v6493_v41  ;;  %v870_v9 = vrot.slane %v5454_v33, %v6493_v41  ;;  %v886_v26 = vrot.slane %v5456_v4, %v6493_v41  ;;  %v902_v38 = vrot.slane %v5458_v3, %v6493_v41 }
 0x219   :  { %v1379_v39 = vrot.slane %v1371_v27, %v6497_v47  ;;  %v1411_v44 = vrot.slane %v1403_v22, %v6497_v47  ;;  %v1372_v50 = vcombine.high %v1306_v18, %v1322_v24  ;;  %v1540_v52 = vcombine.high %v6659_v35, %v6662_v36  ;;  %v1566_v20 = vpop.permute.xlu1 %1565 }
 0x21a   :  { %v919_v40 = vcombine.low %v854_v8, %v870_v9  ;;  %v951_v51 = vcombine.low %v886_v26, %v902_v38  ;;  %v1404_v53 = vcombine.high %v1338_v61, %v1354_v21  ;;  %v784_v42 = vcombine.high %v6708_v59, %v6711_v60 }
 0x21b   :  { %v1423_v54 = vcombine.low %v1379_v39, %v1411_v44  ;;  %v816_v37 = vcombine.high %v6729_v25, %v6732_v2  ;;  %v920_v43 = vcombine.high %v854_v8, %v870_v9  ;;  %v835_v5 = vcombine.low %v791_v45, %v823_v49 }
 0x21c   :  { %v927_v55 = vrot.slane %v919_v40, %v6497_v47  ;;  %v959_v56 = vrot.slane %v951_v51, %v6497_v47  ;;  %v952_v34 = vcombine.high %v886_v26, %v902_v38  ;;  %v1560_v36 = vcombine.high %v6750_v46, %v6753_v48 }
 0x21d   :  { %5744 = vmatpush3.xpose.msk.msra.mxu0 %vm2151_vm2, %v1423_v54  ;;  %v1386_v57 = vrot.slane %v1372_v50, %v6497_v47  ;;  %v1424_v62 = vcombine.high %v1379_v39, %v1411_v44  ;;  %v1418_v63 = vrot.slane %v1404_v53, %v6497_v47  ;;  %v1522_v59 = vrot.slane %v1508_v14, %v6497_v47  ;;  %v1578_v7 = vpop.permute.xlu1 %1577 }
 0x21e   :  { %5753 = vmatprep.subr.mxu0 %v6229_v28  ;;  %v971_v35 = vcombine.low %v927_v55, %v959_v56  ;;  %v1554_v60 = vrot.slane %v1540_v52, %v6497_v47  ;;  %v836_v25 = vcombine.high %v791_v45, %v823_v49  ;;  %v798_v2 = vrot.slane %v784_v42, %v6497_v47 }
 0x21f   :  { %v830_v46 = vrot.slane %v816_v37, %v6497_v47  ;;  %v972_v48 = vcombine.high %v927_v55, %v959_v56  ;;  %v934_v0 = vrot.slane %v920_v43, %v6497_v47  ;;  %v966_v31 = vrot.slane %v952_v34, %v6497_v47 }
 0x220   :  { %5746 = vmatmul.mubr.msk.f32.vlgmr.msra.gmra.mrb[6].mxu0 %vm2151_vm2, %v835_v5  ;;  %5751 = vmatmul.mubr.msk.f32.vlgmr.msra.gmra.mrb[16].mxu1 %vm2151_vm2, %v971_v35  ;;  %v1425_v1 = vcombine.low %v1386_v57, %v1418_v63  ;;  %v1561_v10 = vcombine.low %v1522_v59, %v1554_v60  ;;  %v1426_v13 = vcombine.high %v1386_v57, %v1418_v63 }
 0x221   :  { %5754 = vmatpush3.xpose.msk.msra.mxu0 %vm2151_vm2, %v1424_v62  ;;  %5759 = vmatpush3.xpose.msk.msra.mxu1 %vm2151_vm2, %v1560_v36  ;;  %v837_v11 = vcombine.low %v798_v2, %v830_v46  ;;  %v973_v12 = vcombine.low %v934_v0, %v966_v31  ;;  %v1562_v15 = vcombine.high %v1522_v59, %v1554_v60 }
 0x222   :  { %5755 = vmatprep.mubr.msk.f32.mxu0 %vm6232_vm1, %v6229_v28  ;;  %5760 = vmatprep.mubr.msk.f32.mxu1 %vm6232_vm1, %v6229_v28  ;;  %v838_v16 = vcombine.high %v798_v2, %v830_v46  ;;  %v974_v17 = vcombine.high %v934_v0, %v966_v31  ;;  %v1607_v18 = vcombine.low %v6485_v30, %v1572_v6 }
 0x223   :  { %5763 = vmatprep.subr.mxu0 %v6229_v28  ;;  %5768 = vmatprep.subr.mxu1 %v6229_v28  ;;  %v1608_v24 = vcombine.high %v6485_v30, %v1572_v6  ;;  %v1623_v23 = vcombine.low %v1566_v20, %v1578_v7  ;;  %v1624_v58 = vcombine.high %v1566_v20, %v1578_v7 }
 0x224   :  { %5756 = vmatmul.mubr.msk.f32.vlgmr.msra.gmra.mrb[8].mxu0 %vm2151_vm2, %v836_v25  ;;  %5761 = vmatmul.mubr.msk.f32.vlgmr.msra.gmra.mrb[18].mxu1 %vm2151_vm2, %v972_v48  ;;  %v1615_v61 = vrot.slane %v1607_v18, %v6493_v41 }
 0x225   :  { %5764 = vmatpush3.xpose.msk.msra.mxu0 %vm2151_vm2, %v1425_v1  ;;  %5769 = vmatpush3.xpose.msk.msra.mxu1 %vm2151_vm2, %v1561_v10  ;;  %v1622_v21 = vrot.slane %v1608_v24, %v6493_v41  ;;  %v1631_v32 = vrot.slane %v1623_v23, %v6493_v41  ;;  %v1638_v33 = vrot.slane %v1624_v58, %v6493_v41 }
 0x226   :  { %5765 = vmatprep.mubr.msk.f32.mxu0 %vm6232_vm1, %v6229_v28  ;;  %5770 = vmatprep.mubr.msk.f32.mxu1 %vm6232_vm1, %v6229_v28 }
 0x227   :  { %5773 = vmatprep.subr.mxu0 %v6229_v28  ;;  %5778 = vmatprep.subr.mxu1 %v6229_v28  ;;  %v1671_v27 = vcombine.low %v1615_v61, %v1631_v32  ;;  %v1672_v4 = vcombine.high %v1615_v61, %v1631_v32  ;;  %v1687_v3 = vcombine.low %v1622_v21, %v1638_v33 }
 0x228   :  { %5766 = vmatmul.mubr.msk.f32.vlgmr.msra.gmra.mrb[10].mxu0 %vm2151_vm2, %v837_v11  ;;  %5771 = vmatmul.mubr.msk.f32.vlgmr.msra.gmra.mrb[20].mxu1 %vm2151_vm2, %v973_v12  ;;  %v1688_v22 = vcombine.high %v1622_v21, %v1638_v33 }
 0x229   :  { %5774 = vmatpush3.xpose.msk.msra.mxu0 %vm2151_vm2, %v1426_v13  ;;  %5779 = vmatpush3.xpose.msk.msra.mxu1 %vm2151_vm2, %v1562_v15  ;;  %v1679_v8 = vrot.slane %v1671_v27, %v6497_v47  ;;  %v1686_v9 = vrot.slane %v1672_v4, %v6497_v47  ;;  %v1695_v26 = vrot.slane %v1687_v3, %v6497_v47 }
 0x22a   :  { %5775 = vmatprep.mubr.msk.f32.mxu0 %vm6232_vm1, %v6229_v28  ;;  %5780 = vmatprep.mubr.msk.f32.mxu1 %vm6232_vm1, %v6229_v28  ;;  %v1702_v38 = vrot.slane %v1688_v22, %v6497_v47 }
 0x22b   :  { %5783 = vmatprep.subr.mxu0 %v6229_v28  ;;  %5788 = vmatprep.subr.mxu1 %v6229_v28  ;;  %v5475_v39 = vcombine.low %v1679_v8, %v1686_v9  ;;  %v5477_v40 = vcombine.high %v1679_v8, %v1686_v9 }
 0x22c   :  { %5776 = vmatmul.mubr.msk.f32.vlgmr.msra.gmra.mrb[12].mxu0 %vm2151_vm2, %v838_v16  ;;  %5781 = vmatmul.mubr.msk.f32.vlgmr.msra.gmra.mrb[22].mxu1 %vm2151_vm2, %v974_v17  ;;  %v5479_v44 = vcombine.low %v1695_v26, %v1702_v38  ;;  %v5481_v45 = vcombine.high %v1695_v26, %v1702_v38 }
 0x22d   :  { %5785 = vmatprep.mubr.msk.f32.mxu0 %vm6232_vm1, %v6229_v28  ;;  %5790 = vmatprep.mubr.msk.f32.mxu1 %vm6232_vm1, %v6229_v28  ;;  %v1887_v49 = vrot.slane %v5475_v39, %v6493_v41  ;;  %v1903_v14 = vrot.slane %v5477_v40, %v6493_v41 }
 0x22e   :  { %v1919_v50 = vrot.slane %v5479_v44, %v6493_v41  ;;  %v1935_v51 = vrot.slane %v5481_v45, %v6493_v41 }
 0x22f   :  { %v1943_v52 = vcombine.low %v1887_v49, %v1903_v14  ;;  %v1944_v42 = vcombine.high %v1887_v49, %v1903_v14 }
 0x230   :  { %v1975_v53 = vcombine.low %v1919_v50, %v1935_v51  ;;  %v1976_v37 = vcombine.high %v1919_v50, %v1935_v51 }
 0x231   :  { %v6875_v54 = vrot.slane %v1943_v52, %v6497_v47  ;;  %v6884_v43 = vrot.slane %v1944_v42, %v6497_v47 }
 0x232   :  { %v6878_v55 = vrot.slane %v1975_v53, %v6497_v47  ;;  %v6887_v5 = vrot.slane %v1976_v37, %v6497_v47 }
 0x234   :  { %v2007_v56 = vcombine.low %v6875_v54, %v6878_v55  ;;  %v2008_v34 = vcombine.high %v6875_v54, %v6878_v55  ;;  %v2009_v35 = vcombine.low %v6884_v43, %v6887_v5  ;;  %v2010_v36 = vcombine.high %v6884_v43, %v6887_v5 }
 0x236   :  { %5784 = vmatpush3.msra.mxu0 %v2007_v56 }
 0x237   :  { %5793 = vmatprep.subr.mxu0 %v6229_v28 }
 0x2cf   :  { %v6895_v57 = vpop.f32.mrb[6].mxu1  ;;  %v6897_v62 = vpop.f32.mrb[0].mxu0 }
 0x2d0   :  { %v5707_v63 = vpop.f32.mrb[7].mxu1  ;;  %v5717_v59 = vpop.f32.mrb[1].mxu0  ;;  %v3369_v60 = vsel %vm3368_vm3, %v6895_v57, -inf  ;;  %v3375_v25 = vsel %vm3368_vm3, %v6897_v62, -inf }
 0x2d1   :  { %3370 = vmax.xlane.f32.xlu0 %v3369_v60 }
 0x2d5   :  { %3376 = vmax.xlane.f32.xlu0 %v3375_v25 }
 0x2d7   :  { %v6905_v46 = vpop.f32.mrb[8].mxu1 }
 0x2d8   :  { %v6903_v2 = vpop.f32.mrb[2].mxu0  ;;  %v5712_v0 = vpop.f32.mrb[9].mxu1  ;;  %v3372_v31 = vsel %vm3368_vm3, %v6905_v46, -inf }
 0x2d9   :  { %v5727_v48 = vpop.f32.mrb[3].mxu0  ;;  %3373 = vmax.xlane.f32.xlu1 %v3372_v31  ;;  %v3381_v13 = vsel %vm3368_vm3, %v6903_v2, -inf }
 0x2db   :  { %v6911_v10 = vpop.f32.mrb[10].mxu1 }
 0x2dc   :  { %v6909_v1 = vpop.f32.mrb[4].mxu0  ;;  %v5722_v12 = vpop.f32.mrb[11].mxu1  ;;  %v3378_v15 = vsel %vm3368_vm3, %v6911_v10, -inf }
 0x2dd   :  { %v5737_v11 = vpop.f32.mrb[5].mxu0  ;;  %3382 = vmax.xlane.f32.xlu1 %v3381_v13  ;;  %3379 = vmax.xlane.f32.xlu0 %v3378_v15  ;;  %v3387_v20 = vsel %vm3368_vm3, %v6909_v1, -inf }
 0x2df   :  { %v6917_v16 = vpop.f32.mrb[12].mxu1 }
 0x2e0   :  { %v5732_v17 = vpop.f32.mrb[13].mxu1  ;;  %v3384_v6 = vsel %vm3368_vm3, %v6917_v16, -inf }
 0x2e1   :  { %3388 = vmax.xlane.f32.xlu1 %v3387_v20  ;;  %3385 = vmax.xlane.f32.xlu0 %v3384_v6 }
 0x2e3   :  { %v6923_v7 = vpop.f32.mrb[14].mxu1 }
 0x2e4   :  { %v5742_v18 = vpop.f32.mrb[15].mxu1  ;;  %v3390_v24 = vsel %vm3368_vm3, %v6923_v7, -inf }
 0x2e5   :  { %3391 = vmax.xlane.f32.xlu0 %v3390_v24 }
 0x2f3   :  { %v6927_v23 = vpop.f32.mrb[6].mxu0  ;;  %v6929_v58 = vpop.f32.mrb[16].mxu1 }
 0x2f4   :  { %v5747_v61 = vpop.f32.mrb[7].mxu0  ;;  %v3393_v21 = vsel %vm3368_vm3, %v6927_v23, -inf  ;;  %v5752_v32 = vpop.f32.mrb[17].mxu1  ;;  %v3396_v33 = vsel %vm3368_vm3, %v6929_v58, -inf }
 0x2f5   :  { %3394 = vmax.xlane.f32.xlu1 %v3393_v21  ;;  %3397 = vmax.xlane.f32.xlu0 %v3396_v33 }
 0x2f7   :  { %v6935_v27 = vpop.f32.mrb[8].mxu0  ;;  %v6937_v4 = vpop.f32.mrb[18].mxu1 }
 0x2f8   :  { %v5757_v3 = vpop.f32.mrb[9].mxu0  ;;  %v3399_v22 = vsel %vm3368_vm3, %v6935_v27, -inf  ;;  %v5762_v8 = vpop.f32.mrb[19].mxu1  ;;  %v3402_v9 = vsel %vm3368_vm3, %v6937_v4, -inf }
 0x2f9   :  { %3400 = vmax.xlane.f32.xlu1 %v3399_v22  ;;  %3403 = vmax.xlane.f32.xlu0 %v3402_v9 }
 0x2fb   :  { %v6943_v26 = vpop.f32.mrb[10].mxu0  ;;  %v6945_v38 = vpop.f32.mrb[20].mxu1 }
 0x2fc   :  { %v5767_v39 = vpop.f32.mrb[11].mxu0  ;;  %v3405_v40 = vsel %vm3368_vm3, %v6943_v26, -inf  ;;  %v5772_v44 = vpop.f32.mrb[21].mxu1  ;;  %v3408_v51 = vsel %vm3368_vm3, %v6945_v38, -inf }
 0x2fd   :  { %3406 = vmax.xlane.f32.xlu1 %v3405_v40 }
 0x2ff   :  { %v6949_v45 = vpop.f32.mrb[12].mxu0  ;;  %v6951_v49 = vpop.f32.mrb[22].mxu1 }
 0x300   :  { %v5777_v14 = vpop.f32.mrb[13].mxu0  ;;  %v5782_v50 = vpop.f32.mrb[23].mxu1  ;;  %v3414_v52 = vsel %vm3368_vm3, %v6951_v49, -inf  ;;  %v3411_v53 = vsel %vm3368_vm3, %v6949_v45, -inf }
 0x30e   :  { %1579 = vrot.lane.b32.xlu1 %v6481_v29, %s6227_s22 }
 0x30f   :  { %1573 = vrot.lane.b32.xlu0 %v6481_v29, %s6225_s6 }
 0x312   :  { %1583 = vrot.lane.b32.xlu1 %v6485_v30, %s6230_s24 }
 0x32e   :  { %3409 = vmax.xlane.f32.xlu0 %v3408_v51 }
 0x332   :  { %3415 = vmax.xlane.f32.xlu0 %v3414_v52 }
 0x336   :  { %3412 = vmax.xlane.f32.xlu1 %v3411_v53 }
 0x35e   :  { %v3371_v56 = vpop.xlane.xlu0 %3370 }
 0x35f   :  { %v3417_v42 = vsub.f32 %v6895_v57, %v3371_v56 }
 0x361   :  { %v3433_v37 = vmul.f32 1.442695, %v3417_v42 }
 0x362   :  { %v3377_v63 = vpop.xlane.xlu0 %3376 }
 0x363   :  { %5964 = vpow2.f32 %v3433_v37  ;;  %v3419_v59 = vsub.f32 %v6897_v62, %v3377_v63 }
 0x365   :  { %v3437_v60 = vmul.f32 1.442695, %v3419_v59 }
 0x366   :  { %v3374_v25 = vpop.xlane.xlu1 %3373 }
 0x367   :  { %5966 = vpow2.f32 %v3437_v60  ;;  %v3418_v48 = vsub.f32 %v6905_v46, %v3374_v25 }
 0x369   :  { %v3435_v0 = vmul.f32 1.442695, %v3418_v48 }
 0x36a   :  { %v3383_v31 = vpop.xlane.xlu1 %3382  ;;  %v3380_v11 = vpop.xlane.xlu0 %3379 }
 0x36b   :  { %5968 = vpow2.f32 %v3435_v0  ;;  %v3421_v12 = vsub.f32 %v6903_v2, %v3383_v31  ;;  %v3420_v13 = vsub.f32 %v6911_v10, %v3380_v11 }
 0x36d   :  { %v6970_v15 = vpop.eup %5964  ;;  %v3441_v57 = vmul.f32 1.442695, %v3421_v12  ;;  %v3439_v17 = vmul.f32 1.442695, %v3420_v13 }
 0x36e   :  { %v3465_v62 = vsel %vm3368_vm3, %v6970_v15, 0.0  ;;  %v3389_v20 = vpop.xlane.xlu1 %3388  ;;  %v3386_v6 = vpop.xlane.xlu0 %3385 }
 0x36f   :  { %3466 = vadd.xlane.f32.xlu1 %v3465_v62  ;;  %5970 = vpow2.f32 %v3441_v57  ;;  %v3423_v46 = vsub.f32 %v6909_v1, %v3389_v20  ;;  %v3422_v18 = vsub.f32 %v6917_v16, %v3386_v6 }
 0x370   :  { %5972 = vpow2.f32 %v3439_v17 }
 0x371   :  { %v6976_v24 = vpop.eup %5966  ;;  %v3445_v2 = vmul.f32 1.442695, %v3423_v46  ;;  %v3443_v10 = vmul.f32 1.442695, %v3422_v18 }
 0x372   :  { %v3471_v61 = vsel %vm3368_vm3, %v6976_v24, 0.0  ;;  %v3392_v21 = vpop.xlane.xlu0 %3391 }
 0x373   :  { %3472 = vadd.xlane.f32.xlu1 %v3471_v61  ;;  %v3424_v32 = vsub.f32 %v6923_v7, %v3392_v21  ;;  %5974 = vpow2.f32 %v3443_v10 }
 0x374   :  { %5976 = vpow2.f32 %v3445_v2 }
 0x375   :  { %v6981_v33 = vpop.eup %5968  ;;  %v3447_v3 = vmul.f32 1.442695, %v3424_v32 }
 0x376   :  { %v3468_v1 = vsel %vm3368_vm3, %v6981_v33, 0.0 }
 0x377   :  { %3469 = vadd.xlane.f32.xlu0 %v3468_v1  ;;  %5978 = vpow2.f32 %v3447_v3 }
 0x379   :  { %v6985_v16 = vpop.eup %5970 }
 0x37a   :  { %v3477_v22 = vsel %vm3368_vm3, %v6985_v16, 0.0  ;;  %v6989_v8 = vpop.eup %5972 }
 0x37b   :  { %3478 = vadd.xlane.f32.xlu0 %v3477_v22  ;;  %v3474_v7 = vsel %vm3368_vm3, %v6989_v8, 0.0 }
 0x37d   :  { %v6991_v9 = vpop.eup %5974 }
 0x37e   :  { %v6995_v39 = vpop.eup %5976  ;;  %v3480_v40 = vsel %vm3368_vm3, %v6991_v9, 0.0 }
 0x37f   :  { %3475 = vadd.xlane.f32.xlu0 %v3474_v7  ;;  %3481 = vadd.xlane.f32.xlu1 %v3480_v40  ;;  %v3483_v44 = vsel %vm3368_vm3, %v6995_v39, 0.0 }
 0x381   :  { %v7001_v51 = vpop.eup %5978 }
 0x382   :  { %v3395_v14 = vpop.xlane.xlu1 %3394  ;;  %v3398_v50 = vpop.xlane.xlu0 %3397  ;;  %v3486_v37 = vsel %vm3368_vm3, %v7001_v51, 0.0 }
 0x383   :  { %3484 = vadd.xlane.f32.xlu0 %v3483_v44  ;;  %v3425_v52 = vsub.f32 %v6927_v23, %v3395_v14  ;;  %v3426_v53 = vsub.f32 %v6929_v58, %v3398_v50 }
 0x385   :  { %v3449_v56 = vmul.f32 1.442695, %v3425_v52  ;;  %v3451_v42 = vmul.f32 1.442695, %v3426_v53 }
 0x386   :  { %v3401_v63 = vpop.xlane.xlu1 %3400  ;;  %v7007_v59 = vpop.xlane.xlu0 %3403 }
 0x387   :  { %5980 = vpow2.f32 %v3449_v56  ;;  %3487 = vadd.xlane.f32.xlu0 %v3486_v37  ;;  %v3428_v60 = vsub.f32 %v6937_v4, %v7007_v59 }
 0x388   :  { %5982 = vpow2.f32 %v3451_v42 }
 0x38a   :  { %v3407_v25 = vpop.xlane.xlu1 %3406  ;;  %v1574_v48 = vpop.permute.xlu0 %1573 }
 0x38b   :  { %v1743_v23 = vcombine.low %v6481_v29, %v1574_v48  ;;  %v1744_v58 = vcombine.high %v6481_v29, %v1574_v48 }
 0x38d   :  { %v1751_v13 = vrot.slane %v1743_v23, %v6493_v41  ;;  %v1758_v57 = vrot.slane %v1744_v58, %v6493_v41 }
 0x38e   :  { %v1580_v0 = vpop.permute.xlu1 %1579 }
 0x38f   :  { %v1759_v31 = vcombine.low %v6850_v19, %v1580_v0  ;;  %v1760_v11 = vcombine.high %v6850_v19, %v1580_v0 }
 0x391   :  { %v7015_v12 = vpop.eup %5980  ;;  %v1767_v17 = vrot.slane %v1759_v31, %v6493_v41  ;;  %v1774_v62 = vrot.slane %v1760_v11, %v6493_v41 }
 0x392   :  { %v7021_v20 = vpop.eup %5982  ;;  %v3489_v6 = vsel %vm3368_vm3, %v7015_v12, 0.0 }
 0x393   :  { %v1807_v46 = vcombine.low %v1751_v13, %v1767_v17  ;;  %v1808_v18 = vcombine.high %v1751_v13, %v1767_v17  ;;  %v1823_v2 = vcombine.low %v1758_v57, %v1774_v62  ;;  %v1824_v10 = vcombine.high %v1758_v57, %v1774_v62  ;;  %3490 = vadd.xlane.f32.xlu1 %v3489_v6 }
 0x394   :  { %v3492_v19 = vsel %vm3368_vm3, %v7021_v20, 0.0  ;;  %v3427_v17 = vsub.f32 %v6935_v27, %v3401_v63  ;;  %v3429_v6 = vsub.f32 %v6943_v26, %v3407_v25 }
 0x395   :  { %v1815_v61 = vrot.slane %v1807_v46, %v6497_v47  ;;  %v1822_v21 = vrot.slane %v1808_v18, %v6497_v47  ;;  %v1831_v32 = vrot.slane %v1823_v2, %v6497_v47  ;;  %v1838_v3 = vrot.slane %v1824_v10, %v6497_v47  ;;  %3493 = vadd.xlane.f32.xlu0 %v3492_v19  ;;  %v7073_v2 = vpop.permute.xlu1 %1583 }
 0x396   :  { %v3453_v62 = vmul.f32 1.442695, %v3427_v17 }
 0x397   :  { %v5483_v1 = vcombine.low %v1815_v61, %v1822_v21  ;;  %v5485_v22 = vcombine.high %v1815_v61, %v1822_v21  ;;  %v5487_v7 = vcombine.low %v1831_v32, %v1838_v3  ;;  %v5489_v40 = vcombine.high %v1831_v32, %v1838_v3 }
 0x398   :  { %5984 = vpow2.f32 %v3453_v62  ;;  %v3455_v32 = vmul.f32 1.442695, %v3428_v60 }
 0x399   :  { %v2023_v44 = vrot.slane %v5483_v1, %v6493_v41  ;;  %v2039_v14 = vrot.slane %v5485_v22, %v6493_v41  ;;  %v2055_v50 = vrot.slane %v5487_v7, %v6493_v41  ;;  %v2071_v52 = vrot.slane %v5489_v40, %v6493_v41 }
 0x39b   :  { %v2079_v53 = vcombine.low %v2023_v44, %v2039_v14  ;;  %v2111_v56 = vcombine.low %v2055_v50, %v2071_v52  ;;  %v2080_v42 = vcombine.high %v2023_v44, %v2039_v14  ;;  %v2112_v37 = vcombine.high %v2055_v50, %v2071_v52 }
 0x39d   :  { %v7036_v48 = vrot.slane %v2079_v53, %v6497_v47  ;;  %v7039_v23 = vrot.slane %v2111_v56, %v6497_v47  ;;  %v7042_v58 = vrot.slane %v2080_v42, %v6497_v47  ;;  %v7045_v0 = vrot.slane %v2112_v37, %v6497_v47 }
 0x39f   :  { %v2143_v31 = vcombine.low %v7036_v48, %v7039_v23  ;;  %v2144_v11 = vcombine.high %v7036_v48, %v7039_v23  ;;  %v2145_v13 = vcombine.low %v7042_v58, %v7045_v0  ;;  %v2146_v57 = vcombine.high %v7042_v58, %v7045_v0 }
 0x3a1   :  { %5789 = vmatpush3.msra.mxu1 %v2143_v31 }
 0x3a2   :  { %5798 = vmatprep.subr.mxu1 %v6229_v28  ;;  %v7077_v26 = vpop.eup %5984 }
 0x3a3   :  { %v3495_v21 = vsel %vm3368_vm3, %v7077_v26, 0.0 }
 0x3a4   :  { %1595 = vrot.lane.b32.xlu1 %v6485_v30, %s6233_s26 }
 0x3a8   :  { %1601 = vrot.lane.b32.xlu1 %v6485_v30, %s6231_s25 }
 0x3ab   :  { %1589 = vrot.lane.b32.xlu0 %v6485_v30, %s6228_s23  ;;  %v3457_v30 = vmul.f32 1.442695, %v3429_v6 }
 0x3ac   :  { %1585 = vrot.lane.b32.xlu1 %v6481_v29, %s6230_s24 }
 0x3ad   :  { %5986 = vpow2.f32 %v3457_v30 }
 0x3b0   :  { %1591 = vrot.lane.b32.xlu1 %v6481_v29, %s6228_s23 }
 0x3b4   :  { %1597 = vrot.lane.b32.xlu1 %v6481_v29, %s6233_s26 }
 0x3b8   :  { %1603 = vrot.lane.b32.xlu1 %v6481_v29, %s6231_s25 }
 0x3bb   :  { %v3410_v46 = vpop.xlane.xlu0 %3409 }
 0x3bc   :  { %v3430_v18 = vsub.f32 %v6945_v38, %v3410_v46  ;;  %v7081_v38 = vpop.eup %5986 }
 0x3be   :  { %v3459_v10 = vmul.f32 1.442695, %v3430_v18 }
 0x3bf   :  { %v3416_v19 = vpop.xlane.xlu0 %3415 }
 0x3c0   :  { %5988 = vpow2.f32 %v3459_v10  ;;  %v3432_v63 = vsub.f32 %v6951_v49, %v3416_v19  ;;  %v3501_v49 = vsel %vm3368_vm3, %v7081_v38, 0.0 }
 0x3c2   :  { %v3463_v29 = vmul.f32 1.442695, %v3432_v63 }
 0x3c3   :  { %v3413_v27 = vpop.xlane.xlu1 %3412 }
 0x3c4   :  { %v3431_v61 = vsub.f32 %v6949_v45, %v3413_v27 }
 0x3c6   :  { %v3461_v25 = vmul.f32 1.442695, %v3431_v61 }
 0x3c8   :  { %5990 = vpow2.f32 %v3461_v25 }
 0x3c9   :  { %5992 = vpow2.f32 %v3463_v29 }
 0x3ca   :  { %3496 = vadd.xlane.f32.xlu0 %v3495_v21  ;;  %v7088_v45 = vpop.eup %5988  ;;  %5994 = vpow2.f32 %v3455_v32 }
 0x3cb   :  { %v3504_v3 = vsel %vm3368_vm3, %v7088_v45, 0.0 }
 0x3ce   :  { %3502 = vadd.xlane.f32.xlu0 %v3501_v49 }
 0x3d2   :  { %v7092_v1 = vpop.eup %5990  ;;  %3505 = vadd.xlane.f32.xlu0 %v3504_v3 }
 0x3d3   :  { %v3507_v22 = vsel %vm3368_vm3, %v7092_v1, 0.0  ;;  %v7096_v4 = vpop.eup %5992 }
 0x3d4   :  { %v7098_v59 = vpop.eup %5994  ;;  %v3510_v60 = vsel %vm3368_vm3, %v7096_v4, 0.0 }
 0x3d5   :  { %v3498_v7 = vsel %vm3368_vm3, %v7098_v59, 0.0 }
 0x3d6   :  { %3508 = vadd.xlane.f32.xlu0 %v3507_v22 }
 0x3da   :  { %3511 = vadd.xlane.f32.xlu0 %v3510_v60 }
 0x3dc   :  { %3499 = vadd.xlane.f32.xlu1 %v3498_v7 }
 0x3fc   :  { %v3467_v40 = vpop.xlane.xlu1 %3466 }
 0x3fd   :  { %5996 = vrcp.f32 %v3467_v40 }
 0x400   :  { %v3473_v44 = vpop.xlane.xlu1 %3472 }
 0x401   :  { %5998 = vrcp.f32 %v3473_v44 }
 0x404   :  { %v3470_v14 = vpop.xlane.xlu0 %3469 }
 0x405   :  { %6000 = vrcp.f32 %v3470_v14 }
 0x407   :  { %v5997_v50 = vpop.eup %5996 }
 0x408   :  { %v3514_v52 = vmul.f32 %v5997_v50, %v6970_v15  ;;  %v3479_v53 = vpop.xlane.xlu0 %3478 }
 0x409   :  { %6002 = vrcp.f32 %v3479_v53 }
 0x40a   :  { %5786 = vmatmul.mubr.msk.f32.vlgmr.msra.gmra.mrb[14].mxu0 %vm3368_vm3, %v3514_v52 }
 0x40b   :  { %v5999_v56 = vpop.eup %5998  ;;  %5794 = vmatpush3.msra.mxu0 %v2008_v34  ;;  %5795 = vmatprep.mubr.msk.f32.mxu0 %vm6232_vm1, %v6229_v28 }
 0x40c   :  { %v3518_v42 = vmul.f32 %v5999_v56, %v6976_v24  ;;  %5803 = vmatprep.subr.mxu0 %v6229_v28  ;;  %v3476_v37 = vpop.xlane.xlu0 %3475  ;;  %v3482_v31 = vpop.xlane.xlu1 %3481 }
 0x40d   :  { %6004 = vrcp.f32 %v3476_v37 }
 0x40e   :  { %5796 = vmatmul.mubr.msk.f32.vlgmr.msra.gmra.mrb[16].mxu0 %vm3368_vm3, %v3518_v42  ;;  %6006 = vrcp.f32 %v3482_v31 }
 0x40f   :  { %5804 = vmatpush3.msra.mxu0 %v2009_v35  ;;  %5805 = vmatprep.mubr.msk.f32.mxu0 %vm6232_vm1, %v6229_v28  ;;  %v6001_v54 = vpop.eup %6000 }
 0x410   :  { %5813 = vmatprep.subr.mxu0 %v6229_v28  ;;  %v3516_v55 = vmul.f32 %v6001_v54, %v6981_v33  ;;  %v3485_v34 = vpop.xlane.xlu0 %3484 }
 0x411   :  { %6008 = vrcp.f32 %v3485_v34 }
 0x412   :  { %5791 = vmatmul.mubr.msk.f32.vlgmr.msra.gmra.mrb[24].mxu1 %vm3368_vm3, %v3516_v55 }
 0x413   :  { %v6003_v15 = vpop.eup %6002  ;;  %5799 = vmatpush3.msra.mxu1 %v2144_v11  ;;  %5800 = vmatprep.mubr.msk.f32.mxu1 %vm6232_vm1, %v6229_v28 }
 0x414   :  { %v3522_v35 = vmul.f32 %v6003_v15, %v6985_v16  ;;  %v3488_v24 = vpop.xlane.xlu0 %3487  ;;  %5808 = vmatprep.subr.mxu1 %v6229_v28 }
 0x415   :  { %6010 = vrcp.f32 %v3488_v24 }
 0x416   :  { %5806 = vmatmul.mubr.msk.f32.vlgmr.msra.gmra.mrb[18].mxu0 %vm3368_vm3, %v3522_v35 }
 0x417   :  { %v6005_v33 = vpop.eup %6004  ;;  %5814 = vmatpush3.msra.mxu0 %v2010_v36  ;;  %5815 = vmatprep.mubr.msk.f32.mxu0 %vm6232_vm1, %v6229_v28 }
 0x418   :  { %v3520_v48 = vmul.f32 %v6005_v33, %v6989_v8  ;;  %5823 = vmatprep.subr.mxu0 %v6229_v28  ;;  %v6007_v23 = vpop.eup %6006 }
 0x419   :  { %v3524_v43 = vmul.f32 %v6007_v23, %v6991_v9 }
 0x41a   :  { %5801 = vmatmul.mubr.msk.f32.vlgmr.msra.gmra.mrb[26].mxu1 %vm3368_vm3, %v3520_v48 }
 0x41b   :  { %v6009_v16 = vpop.eup %6008  ;;  %5809 = vmatpush3.msra.mxu1 %v2145_v13  ;;  %5810 = vmatprep.mubr.msk.f32.mxu1 %vm6232_vm1, %v6229_v28 }
 0x41c   :  { %v3526_v5 = vmul.f32 %v6009_v16, %v6995_v39  ;;  %5818 = vmatprep.subr.mxu1 %v6229_v28 }
 0x41e   :  { %5811 = vmatmul.mubr.msk.f32.vlgmr.msra.gmra.mrb[28].mxu1 %vm3368_vm3, %v3524_v43  ;;  %5816 = vmatmul.mubr.msk.f32.vlgmr.msra.gmra.mrb[20].mxu0 %vm3368_vm3, %v3526_v5 }
 0x41f   :  { %v6011_v36 = vpop.eup %6010  ;;  %5819 = vmatpush3.msra.mxu1 %v2146_v57  ;;  %5820 = vmatprep.mubr.msk.f32.mxu1 %vm6232_vm1, %v6229_v28 }
 0x420   :  { %v3528_v8 = vmul.f32 %v6011_v36, %v7001_v51  ;;  %v3491_v11 = vpop.xlane.xlu1 %3490  ;;  %5825 = vmatprep.mubr.msk.f32.mxu0 %vm6232_vm1, %v6229_v28  ;;  %5828 = vmatprep.subr.mxu1 %v6229_v28 }
 0x421   :  { %6012 = vrcp.f32 %v3491_v11 }
 0x422   :  { %5821 = vmatmul.mubr.msk.f32.vlgmr.msra.gmra.mrb[30].mxu1 %vm3368_vm3, %v3528_v8  ;;  %v3494_v9 = vpop.xlane.xlu0 %3493 }
 0x423   :  { %5830 = vmatprep.mubr.msk.f32.mxu1 %vm6232_vm1, %v6229_v28  ;;  %6014 = vrcp.f32 %v3494_v9 }
 0x424   :  { %v1596_v39 = vpop.permute.xlu1 %1595 }
 0x425   :  { %v1639_v58 = vcombine.low %v7073_v2, %v1596_v39  ;;  %v1640_v0 = vcombine.high %v7073_v2, %v1596_v39 }
 0x426   :  { %v1590_v13 = vpop.permute.xlu0 %1589 }
 0x427   :  { %v1647_v62 = vrot.slane %v1639_v58, %v6493_v41  ;;  %v1654_v6 = vrot.slane %v1640_v0, %v6493_v41 }
 0x428   :  { %v1602_v57 = vpop.permute.xlu1 %1601 }
 0x429   :  { %v1655_v51 = vcombine.low %v1590_v13, %v1602_v57  ;;  %v1656_v17 = vcombine.high %v1590_v13, %v1602_v57 }
 0x42b   :  { %v1663_v46 = vrot.slane %v1655_v51, %v6493_v41  ;;  %v1670_v30 = vrot.slane %v1656_v17, %v6493_v41  ;;  %v6013_v53 = vpop.eup %6012 }
 0x42c   :  { %v1586_v18 = vpop.permute.xlu1 %1585  ;;  %v3530_v35 = vmul.f32 %v6013_v53, %v7015_v12 }
 0x42d   :  { %v1703_v10 = vcombine.low %v1647_v62, %v1663_v46  ;;  %v1704_v19 = vcombine.high %v1647_v62, %v1663_v46  ;;  %v1719_v27 = vcombine.low %v1654_v6, %v1670_v30  ;;  %v1720_v63 = vcombine.high %v1654_v6, %v1670_v30 }
 0x42f   :  { %v1711_v2 = vrot.slane %v1703_v10, %v6497_v47  ;;  %v1718_v61 = vrot.slane %v1704_v19, %v6497_v47  ;;  %v1727_v25 = vrot.slane %v1719_v27, %v6497_v47  ;;  %v1734_v29 = vrot.slane %v1720_v63, %v6497_v47 }
 0x430   :  { %v1592_v21 = vpop.permute.xlu1 %1591 }
 0x431   :  { %v5476_v32 = vcombine.low %v1711_v2, %v1718_v61  ;;  %v5478_v49 = vcombine.high %v1711_v2, %v1718_v61  ;;  %v5480_v3 = vcombine.low %v1727_v25, %v1734_v29  ;;  %v5482_v22 = vcombine.high %v1727_v25, %v1734_v29 }
 0x433   :  { %v7171_v60 = vrot.slane %v5476_v32, %v6493_v41  ;;  %v7174_v7 = vrot.slane %v5478_v49, %v6493_v41  ;;  %v7177_v40 = vrot.slane %v5480_v3, %v6493_v41  ;;  %v7180_v44 = vrot.slane %v5482_v22, %v6493_v41 }
 0x434   :  { %v1598_v14 = vpop.permute.xlu1 %1597 }
 0x435   :  { %v1959_v50 = vcombine.low %v7171_v60, %v7174_v7  ;;  %v1991_v52 = vcombine.low %v7177_v40, %v7180_v44  ;;  %v1775_v56 = vcombine.low %v1586_v18, %v1598_v14  ;;  %v1776_v42 = vcombine.high %v1586_v18, %v1598_v14  ;;  %v6015_v18 = vpop.eup %6014 }
 0x436   :  { %v3532_v63 = vmul.f32 %v6015_v18, %v7021_v20  ;;  %v1960_v25 = vcombine.high %v7171_v60, %v7174_v7  ;;  %v1992_v20 = vcombine.high %v7177_v40, %v7180_v44 }
 0x437   :  { %v1967_v37 = vrot.slane %v1959_v50, %v6497_v47  ;;  %v1999_v31 = vrot.slane %v1991_v52, %v6497_v47  ;;  %v1783_v24 = vrot.slane %v1775_v56, %v6493_v41  ;;  %v1790_v33 = vrot.slane %v1776_v42, %v6493_v41 }
 0x438   :  { %v1604_v54 = vpop.permute.xlu1 %1603  ;;  %v2006_v32 = vrot.slane %v1992_v20, %v6497_v47 }
 0x439   :  { %v1791_v55 = vcombine.low %v1592_v21, %v1604_v54  ;;  %v1792_v34 = vcombine.high %v1592_v21, %v1604_v54  ;;  %v2011_v15 = vcombine.low %v1967_v37, %v1999_v31  ;;  %v2012_v16 = vcombine.high %v1967_v37, %v1999_v31  ;;  %v4713_v31 = vld [vmem:[#allocation13] sm:$0xf] }
 0x43a   :  { %v1974_v21 = vrot.slane %v1960_v25, %v6497_v47 }
 0x43b   :  { %v1799_v48 = vrot.slane %v1791_v55, %v6493_v41  ;;  %v1806_v23 = vrot.slane %v1792_v34, %v6493_v41  ;;  %5824 = vmatpush3.msra.mxu0 %v2011_v15 }
 0x43c   :  { %5826 = vmatmul.mubr.msk.f32.vlgmr.msra.gmra.mrb[22].mxu0 %vm3368_vm3, %v3530_v35  ;;  %5833 = vmatprep.subr.mxu0 %v6229_v28  ;;  %v2013_v14 = vcombine.low %v1974_v21, %v2006_v32  ;;  %v2014_v7 = vcombine.high %v1974_v21, %v2006_v32  ;;  %v5563_v32 = vld [vmem:[%s7301_s7] ss:$0 sm:$0xff] }
 0x43d   :  { %v1839_v43 = vcombine.low %v1783_v24, %v1799_v48  ;;  %v1840_v5 = vcombine.high %v1783_v24, %v1799_v48  ;;  %v1855_v36 = vcombine.low %v1790_v33, %v1806_v23  ;;  %v1856_v8 = vcombine.high %v1790_v33, %v1806_v23  ;;  %5834 = vmatpush3.msra.mxu0 %v2012_v16 }
 0x43e   :  { %5835 = vmatprep.mubr.msk.f32.mxu0 %vm6232_vm1, %v6229_v28  ;;  %5843 = vmatprep.subr.mxu0 %v6229_v28 }
 0x43f   :  { %v1847_v12 = vrot.slane %v1839_v43, %v6497_v47  ;;  %v1854_v11 = vrot.slane %v1840_v5, %v6497_v47  ;;  %v1863_v9 = vrot.slane %v1855_v36, %v6497_v47  ;;  %v1870_v39 = vrot.slane %v1856_v8, %v6497_v47  ;;  %v4715_v8 = vld [vmem:[#allocation13 + $0x8] sm:$0xf] }
 0x441   :  { %v5484_v58 = vcombine.low %v1847_v12, %v1854_v11  ;;  %v5486_v0 = vcombine.high %v1847_v12, %v1854_v11  ;;  %v5488_v13 = vcombine.low %v1863_v9, %v1870_v39  ;;  %v5490_v57 = vcombine.high %v1863_v9, %v1870_v39 }
 0x443   :  { %v2030_v51 = vrot.slane %v5484_v58, %v6493_v41  ;;  %v2046_v17 = vrot.slane %v5486_v0, %v6493_v41  ;;  %v2062_v62 = vrot.slane %v5488_v13, %v6493_v41  ;;  %v2078_v6 = vrot.slane %v5490_v57, %v6493_v41  ;;  %v4716_v58 = vld [vmem:[#allocation13 + $0xc] sm:$0xf]  ;;  %v4717_v13 = vld [vmem:[#allocation13 + $0x10] sm:$0xf]  ;;  %v4718_v57 = vld [vmem:[#allocation13 + $0x14] sm:$0xf] }
 0x445   :  { %v2095_v46 = vcombine.low %v2030_v51, %v2046_v17  ;;  %v2127_v30 = vcombine.low %v2062_v62, %v2078_v6  ;;  %v2096_v53 = vcombine.high %v2030_v51, %v2046_v17 }
 0x447   :  { %v2103_v10 = vrot.slane %v2095_v46, %v6497_v47  ;;  %v2135_v19 = vrot.slane %v2127_v30, %v6497_v47  ;;  %v2110_v42 = vrot.slane %v2096_v53, %v6497_v47 }
 0x449   :  { %v2147_v27 = vcombine.low %v2103_v10, %v2135_v19  ;;  %v2148_v2 = vcombine.high %v2103_v10, %v2135_v19 }
 0x44b   :  { %5829 = vmatpush3.msra.mxu1 %v2147_v27 }
 0x44c   :  { %5831 = vmatmul.mubr.msk.f32.vlgmr.msra.gmra.mrb[32].mxu1 %vm3368_vm3, %v3532_v63  ;;  %5838 = vmatprep.subr.mxu1 %v6229_v28 }
 0x44d   :  { %5839 = vmatpush3.msra.mxu1 %v2148_v2  ;;  %5840 = vmatprep.mubr.msk.f32.mxu1 %vm6232_vm1, %v6229_v28 }
 0x44e   :  { %5848 = vmatprep.subr.mxu1 %v6229_v28 }
 0x457   :  { %v3497_v41 = vpop.xlane.xlu0 %3496 }
 0x458   :  { %6016 = vrcp.f32 %v3497_v41  ;;  %v4720_v41 = vld [vmem:[#allocation13 + $0x1c] sm:$0xf] }
 0x45b   :  { %v3503_v61 = vpop.xlane.xlu0 %3502 }
 0x45c   :  { %6018 = vrcp.f32 %v3503_v61 }
 0x45f   :  { %v3506_v29 = vpop.xlane.xlu0 %3505 }
 0x462   :  { %v6017_v49 = vpop.eup %6016 }
 0x463   :  { %v3534_v3 = vmul.f32 %v6017_v49, %v7077_v26  ;;  %v3509_v22 = vpop.xlane.xlu0 %3508  ;;  %v4714_v26 = vld [vmem:[#allocation13 + $0x4] sm:$0xf] }
 0x464   :  { %6020 = vrcp.f32 %v3509_v22 }
 0x465   :  { %5836 = vmatmul.mubr.msk.f32.vlgmr.msra.gmra.mrb[24].mxu0 %vm3368_vm3, %v3534_v3 }
 0x466   :  { %v6019_v50 = vpop.eup %6018  ;;  %5844 = vmatpush3.msra.mxu0 %v2013_v14  ;;  %5845 = vmatprep.mubr.msk.f32.mxu0 %vm6232_vm1, %v6229_v28 }
 0x467   :  { %v3538_v60 = vmul.f32 %v6019_v50, %v7081_v38  ;;  %5853 = vmatprep.subr.mxu0 %v6229_v28  ;;  %v3512_v44 = vpop.xlane.xlu0 %3511  ;;  %v2128_v38 = vcombine.high %v2062_v62, %v2078_v6  ;;  %v4719_v6 = vld [vmem:[#allocation13 + $0x18] sm:$0xf] }
 0x469   :  { %5846 = vmatmul.mubr.msk.f32.vlgmr.msra.gmra.mrb[26].mxu0 %vm3368_vm3, %v3538_v60  ;;  %v3500_v40 = vpop.xlane.xlu1 %3499  ;;  %v2142_v37 = vrot.slane %v2128_v38, %v6497_v47 }
 0x46a   :  { %5854 = vmatpush3.msra.mxu0 %v2014_v7  ;;  %6022 = vrcp.f32 %v3500_v40  ;;  %5855 = vmatprep.mubr.msk.f32.mxu0 %vm6232_vm1, %v6229_v28 }
 0x46b   :  { %5863 = vmatprep.subr.msk.mxu0 %vm4727_vm4, %v4714_v26  ;;  %6024 = vrcp.f32 %v3506_v29  ;;  %v2149_v15 = vcombine.low %v2110_v42, %v2142_v37  ;;  %v2150_v35 = vcombine.high %v2110_v42, %v2142_v37 }
 0x46c   :  { %6026 = vrcp.f32 %v3512_v44 }
 0x46e   :  { %v6021_v52 = vpop.eup %6020 }
 0x46f   :  { %v3542_v56 = vmul.f32 %v6021_v52, %v7092_v1 }
 0x471   :  { %5856 = vmatmul.mubr.msk.f32.vlgmr.msra.gmra.mrb[28].mxu0 %vm3368_vm3, %v3542_v56 }
 0x472   :  { %5864 = vmatpush3.msk.msra.mxu0 %vm4727_vm4, %v4714_v26 }
 0x473   :  { %5868 = vmatprep.subr.msk.mxu0 %vm4727_vm4, %v4713_v31 }
 0x474   :  { %v6023_v54 = vpop.eup %6022 }
 0x475   :  { %v3536_v55 = vmul.f32 %v6023_v54, %v7098_v59  ;;  %v6025_v34 = vpop.eup %6024 }
 0x476   :  { %v3540_v1 = vmul.f32 %v6025_v34, %v7088_v45  ;;  %v6027_v47 = vpop.eup %6026 }
 0x477   :  { %5841 = vmatmul.mubr.msk.f32.vlgmr.msra.gmra.mrb[34].mxu1 %vm3368_vm3, %v3536_v55  ;;  %v3544_v59 = vmul.f32 %v6027_v47, %v7096_v4 }
 0x478   :  { %5849 = vmatpush3.msra.mxu1 %v2149_v15  ;;  %5850 = vmatprep.mubr.msk.f32.mxu1 %vm6232_vm1, %v6229_v28 }
 0x479   :  { %5858 = vmatprep.subr.mxu1 %v6229_v28 }
 0x47b   :  { %5851 = vmatmul.mubr.msk.f32.vlgmr.msra.gmra.mrb[36].mxu1 %vm3368_vm3, %v3540_v1 }
 0x47c   :  { %5859 = vmatpush3.msra.mxu1 %v2150_v35  ;;  %5860 = vmatprep.mubr.msk.f32.mxu1 %vm6232_vm1, %v6229_v28 }
 0x47f   :  { %5861 = vmatmul.mubr.msk.f32.vlgmr.msra.gmra.mrb[38].mxu1 %vm3368_vm3, %v3544_v59 }
 0x4dd   :  { %v3614_v24 = vpop.f32.mrb[14].mxu0 }
 0x4de   :  { %v5787_v33 = vpop.f32.mrb[15].mxu0 }
 0x4e1   :  { %v3760_v48 = vpop.f32.mrb[16].mxu0 }
 0x4e2   :  { %v5797_v23 = vpop.f32.mrb[17].mxu0  ;;  %5865 = vmatprep.mubr.msk.f32.mxu0 %vm2151_vm2, %v3760_v48 }
 0x4e5   :  { %v3687_v45 = vpop.f32.mrb[24].mxu1 }
 0x4e6   :  { %v5792_v16 = vpop.f32.mrb[25].mxu1 }
 0x4e9   :  { %v3906_v43 = vpop.f32.mrb[18].mxu0 }
 0x4ea   :  { %v5807_v5 = vpop.f32.mrb[19].mxu0 }
 0x4ed   :  { %v3833_v36 = vpop.f32.mrb[26].mxu1 }
 0x4ee   :  { %v5802_v12 = vpop.f32.mrb[27].mxu1  ;;  %5866 = vmatmul.mubr.msk.f32.vlgmr.msra.gmra.mrb[30].mxu0 %vm2151_vm2, %v3833_v36 }
 0x4ef   :  { %5870 = vmatprep.mubr.msk.f32.mxu0 %vm2151_vm2, %v3614_v24  ;;  %5869 = vmatpush3.msk.msra.mxu0 %vm4727_vm4, %v4713_v31 }
 0x4f0   :  { %5873 = vmatprep.subr.msk.mxu0 %vm4727_vm4, %v4715_v8 }
 0x4f1   :  { %v3979_v28 = vpop.f32.mrb[28].mxu1  ;;  %v4052_v4 = vpop.f32.mrb[20].mxu0 }
 0x4f2   :  { %v5812_v11 = vpop.f32.mrb[29].mxu1  ;;  %v5817_v9 = vpop.f32.mrb[21].mxu0 }
 0x4f5   :  { %v4125_v39 = vpop.f32.mrb[30].mxu1 }
 0x4f6   :  { %v5822_v0 = vpop.f32.mrb[31].mxu1  ;;  %5871 = vmatmul.mubr.msk.f32.vlgmr.msra.gmra.mrb[30].mxu0 %vm2151_vm2, %v3687_v45 }
 0x4f7   :  { %5875 = vmatprep.mubr.msk.f32.mxu0 %vm2151_vm2, %v3906_v43  ;;  %5874 = vmatpush3.msk.msra.mxu0 %vm4727_vm4, %v4715_v8 }
 0x4f8   :  { %5878 = vmatprep.subr.msk.mxu0 %vm4727_vm4, %v4716_v58 }
 0x4fe   :  { %5876 = vmatmul.mubr.msk.f32.vlgmr.msra.gmra.mrb[30].mxu0 %vm2151_vm2, %v3979_v28 }
 0x4ff   :  { %5880 = vmatprep.mubr.msk.f32.mxu0 %vm2151_vm2, %v4052_v4  ;;  %5879 = vmatpush3.msk.msra.mxu0 %vm4727_vm4, %v4716_v58 }
 0x500   :  { %5883 = vmatprep.subr.msk.mxu0 %vm4727_vm4, %v4717_v13 }
 0x506   :  { %5881 = vmatmul.mubr.msk.f32.vlgmr.msra.gmra.mrb[30].mxu0 %vm2151_vm2, %v4125_v39 }
 0x507   :  { %5884 = vmatpush3.msk.msra.mxu0 %vm4727_vm4, %v4717_v13 }
 0x508   :  { %5888 = vmatprep.subr.msk.mxu0 %vm4727_vm4, %v4718_v57 }
 0x50f   :  { %v4198_v51 = vpop.f32.mrb[22].mxu0 }
 0x510   :  { %v5827_v17 = vpop.f32.mrb[23].mxu0  ;;  %5885 = vmatprep.mubr.msk.f32.mxu0 %vm2151_vm2, %v4198_v51 }
 0x51f   :  { %v4271_v62 = vpop.f32.mrb[32].mxu1 }
 0x520   :  { %v5832_v46 = vpop.f32.mrb[33].mxu1  ;;  %5886 = vmatmul.mubr.msk.f32.vlgmr.msra.gmra.mrb[30].mxu0 %vm2151_vm2, %v4271_v62 }
 0x521   :  { %5889 = vmatpush3.msk.msra.mxu0 %vm4727_vm4, %v4718_v57 }
 0x522   :  { %5893 = vmatprep.subr.msk.mxu0 %vm4727_vm4, %v4719_v6 }
 0x538   :  { %v4344_v30 = vpop.f32.mrb[24].mxu0 }
 0x539   :  { %v5837_v18 = vpop.f32.mrb[25].mxu0  ;;  %5890 = vmatprep.mubr.msk.f32.mxu0 %vm2151_vm2, %v4344_v30 }
 0x53c   :  { %v4490_v10 = vpop.f32.mrb[26].mxu0 }
 0x53d   :  { %v5847_v19 = vpop.f32.mrb[27].mxu0 }
 0x544   :  { %v4636_v27 = vpop.f32.mrb[28].mxu0 }
 0x545   :  { %v5857_v63 = vpop.f32.mrb[29].mxu0 }
 0x54a   :  { %v4417_v2 = vpop.f32.mrb[34].mxu1 }
 0x54b   :  { %v5842_v61 = vpop.f32.mrb[35].mxu1  ;;  %5891 = vmatmul.mubr.msk.f32.vlgmr.msra.gmra.mrb[30].mxu0 %vm2151_vm2, %v4417_v2 }
 0x54c   :  { %5894 = vmatpush3.msk.msra.mxu0 %vm4727_vm4, %v4719_v6  ;;  %5895 = vmatprep.mubr.msk.f32.mxu0 %vm2151_vm2, %v4490_v10 }
 0x54d   :  { %5898 = vmatprep.subr.msk.mxu0 %vm4727_vm4, %v4720_v41 }
 0x54e   :  { %v4563_v25 = vpop.f32.mrb[36].mxu1 }
 0x54f   :  { %v5852_v20 = vpop.f32.mrb[37].mxu1 }
 0x552   :  { %v4709_v29 = vpop.f32.mrb[38].mxu1 }
 0x553   :  { %v5862_v21 = vpop.f32.mrb[39].mxu1  ;;  %5896 = vmatmul.mubr.msk.f32.vlgmr.msra.gmra.mrb[30].mxu0 %vm2151_vm2, %v4563_v25 }
 0x554   :  { %5899 = vmatpush3.msk.msra.mxu0 %vm4727_vm4, %v4720_v41  ;;  %5900 = vmatprep.mubr.msk.f32.mxu0 %vm2151_vm2, %v4636_v27 }
 0x55b   :  { %5901 = vmatmul.mubr.msk.f32.vlgmr.msra.gmra.mrb[30].mxu0 %vm2151_vm2, %v4709_v29 }
 0x62e   :  { %v5902_v49 = vpop.f32.mrb[30].mxu0 }
 0x62f   :  { %v5414_v3 = vadd.f32 %v5902_v49, %v5563_v32  ;;  %v5395_v22 = vpop.f32.mrb[31].mxu0 }
 0x630   :  { %v5413_v14 = vadd.f32 %v5563_v32, %v5395_v22 }
 0x631   :  { %5416 = vst [vmem:[#allocation14 + $0x8] sm:$0xff] %v5414_v3 }
 0x632   :  { %5415 = vst [vmem:[#allocation14] sm:$0xff] %v5413_v14 }
 0x633   :  { %6193 = shalt.err (!%p6190_p4)
}
 0x634   :  { %s6194_s7 = scalar_lea.hbm %s7302_s8, 256 }
 0x635   :  { %p6195_p5 = scmp.ne.s32.totalorder %s7302_s8, %s6194_s7  ;;  %p6198_p6 = scmp.lt.u32.totalorder %s6194_s7, %s7302_s8 }
 0x637   :  { %p6200_p7 = pnand %p6198_p6, %p6195_p5 }
 0x639   :  { %6203 = shalt.err (!%p6200_p7)
}
 0x63a   :  { %5428 = dma.vmem_to_hbm [thread:$0]  %s5423_s28, 256, %s7302_s8, [#allocation4], %s6216_s17, %s6216_s17, %s6217_s18  }
 0x63b   :  { %6212 = dma.done.wait [#allocation4], 256  }
 0x63c   :  { %6213 = vsyncadd [#allocation4], 4294967040 }
 0x63d   :  { %5432 = vsyncpa [#allocation3], 1 }
 0x63e   :  { %5433 = vsyncpa [#allocation6], 1 }
 0x63f   :  { %5434 = vsyncpa [#allocation9], 1 }
 0x640   :  { %5435 = vsyncpa [#allocation12], 1 }
 0x641   :  { %5436 = vsyncpa [#allocation4], 1 }

</bundles_post_ra>
